<compile_context>
chip_gen: v7x
topology: tpu7x:2x2x1
jax: 0.10.0
libtpu: 0.0.40
codegen_flags: <defaults>
</compile_context>

<pallas_src>
import jax
import jax.numpy as jnp
from jax import lax
from jax.experimental import pallas as pl
from jax.experimental.pallas import tpu as pltpu

IN_F = 2048
HID = 512
OUT_F = 11
OUT_PAD = 128  # pad head output to a full lane width
BN_EPS = 1e-5


def _mlp_kernel(x_ref, w1_ref, b1_ref, w2_ref, b2_ref, o_ref):
    # Linear(2048->512): bf16 operands on the MXU, f32 accumulation.
    h = jnp.dot(x_ref[...], w1_ref[...], preferred_element_type=jnp.float32)
    h = jnp.maximum(h + b1_ref[...], 0.0)  # bias + ReLU
    # BatchNorm (eval, running stats) is folded into w2/b2 in the wrapper.
    # Dropout(0.3) is identity in eval mode.
    # TODO(synk): train-mode dropout (pltpu.prng_random_bits mask) / batch-stat BN not implemented.
    o_ref[...] = (
        jnp.dot(h, w2_ref[...], preferred_element_type=jnp.float32) + b2_ref[...]
    )


def _round_up(n, m):
    return ((n + m - 1) // m) * m


def multi_classifier_forward(x, params):
    """x: (B, 2048) float32 -> (B, 11) float32 (eval-mode forward)."""
    w1_t, b1, gamma, beta, run_mean, run_var, w2_t, b2 = params
    B = x.shape[0]

    # ---- Fold eval-mode BatchNorm into the head linear (BN is affine after ReLU) ----
    s = gamma * lax.rsqrt(run_var + BN_EPS)            # (512,)
    w2_fold = w2_t * s[:, None]                        # (512, 11)
    b2_fold = b2 + (beta - run_mean * s) @ w2_t        # (11,)

    # ---- Pad the 11-wide head to a full 128-lane output block -----------------------
    w2_pad = jnp.zeros((HID, OUT_PAD), jnp.float32).at[:, :OUT_F].set(w2_fold)
    b2_pad = jnp.zeros((1, OUT_PAD), jnp.float32).at[:, :OUT_F].set(b2_fold)
    b1_r = b1.reshape(1, HID).astype(jnp.float32)

    # ---- bf16 for the big (DMA-dominant) first matmul; accumulate in f32 ------------
    w1_bf16 = w1_t.astype(jnp.bfloat16)

    # ---- Batch tiling: 1-D grid over rows; weights stay VMEM-resident ---------------
    TM = min(256, _round_up(B, 8))   # cap the tile so buffers fit v7x's 64 MiB VMEM
    B_pad = _round_up(B, TM)
    x_p = x if B_pad == B else jnp.pad(x, ((0, B_pad - B), (0, 0)))
    x_bf16 = x_p.astype(jnp.bfloat16)
    grid = (B_pad // TM,)

    out_padded = pl.pallas_call(
        _mlp_kernel,
        out_shape=jax.ShapeDtypeStruct((B_pad, OUT_PAD), jnp.float32),
        grid_spec=pltpu.PrefetchScalarGridSpec(
            num_scalar_prefetch=0,
            grid=grid,
            in_specs=[
                pl.BlockSpec((TM, IN_F), lambda i: (i, 0)),      # x tile (pipelined)
                pl.BlockSpec((IN_F, HID), lambda i: (0, 0)),     # w1^T (resident, bf16)
                pl.BlockSpec((1, HID), lambda i: (0, 0)),        # b1 (resident)
                pl.BlockSpec((HID, OUT_PAD), lambda i: (0, 0)),  # folded w2 (resident)
                pl.BlockSpec((1, OUT_PAD), lambda i: (0, 0)),    # folded b2 (resident)
            ],
            out_specs=pl.BlockSpec((TM, OUT_PAD), lambda i: (i, 0)),
        ),
        compiler_params=pltpu.CompilerParams(
            dimension_semantics=("parallel",),   # shard batch tiles across TCs on v7x
            vmem_limit_bytes=32 << 20,           # headroom under v7x's 64 MiB VMEM
        ),
    )(x_bf16, w1_bf16, b1_r, w2_pad, b2_pad)

    return out_padded[:B, :OUT_F]


def init_params(key):
    k1, k2, k3, k4 = jax.random.split(key, 4)
    # Linear(2048, 512): stored transposed (in, out)
    w1_t = jax.random.normal(k1, (IN_F, HID), jnp.float32) * (1.0 / jnp.sqrt(IN_F))
    b1 = jax.random.normal(k2, (HID,), jnp.float32) * 0.01
    # BatchNorm1d(512): PyTorch defaults weight=1, bias=0, running_mean=0, running_var=1
    gamma = jnp.ones((HID,), jnp.float32)
    beta = jnp.zeros((HID,), jnp.float32)
    run_mean = jnp.zeros((HID,), jnp.float32)
    run_var = jnp.ones((HID,), jnp.float32)
    # Linear(512, 11): stored transposed (in, out)
    w2_t = jax.random.normal(k3, (HID, OUT_F), jnp.float32) * (1.0 / jnp.sqrt(HID))
    b2 = jax.random.normal(k4, (OUT_F,), jnp.float32) * 0.01
    return (w1_t, b1, gamma, beta, run_mean, run_var, w2_t, b2)


def reference_forward(x, params):
    """Full-f32 eval-mode reference (matches PyTorch module.eval())."""
    w1_t, b1, gamma, beta, run_mean, run_var, w2_t, b2 = params
    h = jnp.maximum(x @ w1_t + b1, 0.0)
    h = (h - run_mean) / jnp.sqrt(run_var + BN_EPS) * gamma + beta
    return h @ w2_t + b2


if __name__ == "__main__":
    key = jax.random.PRNGKey(0)
    pkey, xkey = jax.random.split(key)
    params = init_params(pkey)

    B = 8
    x = jax.random.normal(xkey, (B, IN_F), jnp.float32)

    fwd = jax.jit(multi_classifier_forward)
    out = fwd(x, params)
    out = jax.block_until_ready(out)

    ref = reference_forward(x, params)
    assert out.shape == (B, OUT_F), out.shape
    # bf16 inputs on the 2048-deep matmul give ~few-1e-3 absolute error vs f32 ref.
    assert jnp.allclose(out, ref, atol=2e-2, rtol=2e-2), float(
        jnp.max(jnp.abs(out - ref))
    )

    print("KERNEL_OK")
</pallas_src>

<mosaic_0001>
module attributes {stable_mosaic.version = 11 : i64} {
  func.func @_mlp_kernel(%arg0: i32, %arg1: memref<8x2048xbf16, #tpu.memory_space<vmem>>, %arg2: memref<2048x512xbf16, #tpu.memory_space<vmem>>, %arg3: memref<1x512xf32, #tpu.memory_space<vmem>>, %arg4: memref<512x128xf32, #tpu.memory_space<vmem>>, %arg5: memref<1x128xf32, #tpu.memory_space<vmem>>, %arg6: memref<8x128xf32, #tpu.memory_space<vmem>>) attributes {dimension_semantics = [#tpu.dimension_semantics<parallel>], iteration_bounds = array<i64: 1>, scalar_prefetch = 0 : i64, scratch_operands = 0 : i64, tpu.core_type = #tpu.core_type<tc>, window_params = [{transform_indices = @transform_0, window_bounds = array<i64: 8, 2048>}, {pipeline_mode = #tpu.pipeline_mode<synchronous>, transform_indices = @transform_1, window_bounds = array<i64: 2048, 512>}, {pipeline_mode = #tpu.pipeline_mode<synchronous>, transform_indices = @transform_2, window_bounds = array<i64: 1, 512>}, {pipeline_mode = #tpu.pipeline_mode<synchronous>, transform_indices = @transform_3, window_bounds = array<i64: 512, 128>}, {pipeline_mode = #tpu.pipeline_mode<synchronous>, transform_indices = @transform_4, window_bounds = array<i64: 1, 128>}, {transform_indices = @transform_5, window_bounds = array<i64: 8, 128>}]} {
    %c0 = arith.constant 0 : index
    %c0_0 = arith.constant 0 : index
    %0 = vector.load %arg1[%c0, %c0_0] : memref<8x2048xbf16, #tpu.memory_space<vmem>>, vector<8x2048xbf16>
    %c0_1 = arith.constant 0 : index
    %c0_2 = arith.constant 0 : index
    %1 = vector.load %arg2[%c0_1, %c0_2] : memref<2048x512xbf16, #tpu.memory_space<vmem>>, vector<2048x512xbf16>
    %cst = arith.constant dense<0.000000e+00> : vector<8x512xf32>
    %2 = tpu.matmul %0, %1, %cst {dimension_numbers = #tpu.dot_dimension_numbers<[1], [0], [0], [1], [0, 0, 1, 1], [], []>} : vector<8x2048xbf16>, vector<2048x512xbf16>, vector<8x512xf32> -> vector<8x512xf32>
    %c0_3 = arith.constant 0 : index
    %c0_4 = arith.constant 0 : index
    %3 = vector.load %arg3[%c0_3, %c0_4] : memref<1x512xf32, #tpu.memory_space<vmem>>, vector<1x512xf32>
    %4 = vector.broadcast %3 : vector<1x512xf32> to vector<8x512xf32>
    %5 = arith.addf %2, %4 : vector<8x512xf32>
    %cst_5 = arith.constant 0.000000e+00 : f32
    %6 = vector.broadcast %cst_5 : f32 to vector<8x512xf32>
    %7 = arith.maximumf %5, %6 : vector<8x512xf32>
    %c0_6 = arith.constant 0 : index
    %c0_7 = arith.constant 0 : index
    %8 = vector.load %arg4[%c0_6, %c0_7] : memref<512x128xf32, #tpu.memory_space<vmem>>, vector<512x128xf32>
    %cst_8 = arith.constant dense<0.000000e+00> : vector<8x128xf32>
    %9 = tpu.matmul %7, %8, %cst_8 {dimension_numbers = #tpu.dot_dimension_numbers<[1], [0], [0], [1], [0, 0, 1, 1], [], []>} : vector<8x512xf32>, vector<512x128xf32>, vector<8x128xf32> -> vector<8x128xf32>
    %c0_9 = arith.constant 0 : index
    %c0_10 = arith.constant 0 : index
    %10 = vector.load %arg5[%c0_9, %c0_10] : memref<1x128xf32, #tpu.memory_space<vmem>>, vector<1x128xf32>
    %11 = vector.broadcast %10 : vector<1x128xf32> to vector<8x128xf32>
    %12 = arith.addf %9, %11 : vector<8x128xf32>
    %c0_11 = arith.constant 0 : index
    %c0_12 = arith.constant 0 : index
    %13 = vector.load %arg6[%c0_11, %c0_12] : memref<8x128xf32, #tpu.memory_space<vmem>>, vector<8x128xf32>
    tpu.vector_store %arg6[%c0_11, %c0_12], %12 {strides = array<i32>} : memref<8x128xf32, #tpu.memory_space<vmem>>, vector<8x128xf32>,
    return
  }
  func.func @transform_0(%arg0: i32) -> (i32, i32) {
    %c0_i32 = arith.constant 0 : i32
    %c0_i32_0 = arith.constant 0 : i32
    return %arg0, %c0_i32 : i32, i32
  }
  func.func @transform_1(%arg0: i32) -> (i32, i32) {
    %c0_i32 = arith.constant 0 : i32
    %c0_i32_0 = arith.constant 0 : i32
    %c0_i32_1 = arith.constant 0 : i32
    return %c0_i32, %c0_i32_0 : i32, i32
  }
  func.func @transform_2(%arg0: i32) -> (i32, i32) {
    %c0_i32 = arith.constant 0 : i32
    %c0_i32_0 = arith.constant 0 : i32
    %c0_i32_1 = arith.constant 0 : i32
    return %c0_i32, %c0_i32_0 : i32, i32
  }
  func.func @transform_3(%arg0: i32) -> (i32, i32) {
    %c0_i32 = arith.constant 0 : i32
    %c0_i32_0 = arith.constant 0 : i32
    %c0_i32_1 = arith.constant 0 : i32
    return %c0_i32, %c0_i32_0 : i32, i32
  }
  func.func @transform_4(%arg0: i32) -> (i32, i32) {
    %c0_i32 = arith.constant 0 : i32
    %c0_i32_0 = arith.constant 0 : i32
    %c0_i32_1 = arith.constant 0 : i32
    return %c0_i32, %c0_i32_0 : i32, i32
  }
  func.func @transform_5(%arg0: i32) -> (i32, i32) {
    %c0_i32 = arith.constant 0 : i32
    %c0_i32_0 = arith.constant 0 : i32
    return %arg0, %c0_i32 : i32, i32
  }
}

</mosaic_0001>

<bundles_post_ra>
// kernel: multi_classifier_forward.1
= control target key start
LH: loop header
LB: loop body
LE: loop exit
PB: predicated region body
PF: predicated region fallthrough
CT: control target
= control target key end

     0   :  { %s7440_s0 = inlined_call_operand.vmem [shape: bf16[8,2048], index: 0, kind: input, shape index: {}]   ;;  %s7441_s1 = inlined_call_operand.vmem [shape: bf16[2048,512], index: 1, kind: input, shape index: {}]   ;;  %s7442_s2 = inlined_call_operand.vmem [shape: f32[1,512], index: 2, kind: input, shape index: {}]   ;;  %s7443_s3 = inlined_call_operand.vmem [shape: f32[512,128], index: 3, kind: input, shape index: {}]   ;;  %s7444_s4 = inlined_call_operand.vmem [shape: f32[1,128], index: 4, kind: input, shape index: {}]   ;;  %s7445_s5 = inlined_call_operand.hbm [shape: f32[8,128], index: 5, kind: output, shape index: {}]  }
   0x1   :  { %v4789_v0 = vld [vmem:[%s7441_s1 + $0x4] ss:$16 sps:$4 sm:$0xff]   ;;  %v4791_v1 = vld [vmem:[%s7441_s1 + $0xc] ss:$16 sps:$4 sm:$0xff]   ;;  %v4793_v2 = vld [vmem:[%s7441_s1] ss:$16 sps:$4 sm:$0xff]  }
   0x2   :  { %3179 = vmatprep.subr.bf16.mxu0 %v4789_v0  ;;  %v4794_v3 = vld [vmem:[%s7441_s1 + $0x8] ss:$16 sps:$4 sm:$0xff]   ;;  %3507 = vmatprep.subr.bf16.mxu1 %v4791_v1  ;;  %v4795_v4 = vld [vmem:[%s7441_s1 + $0x24] ss:$16 sps:$4 sm:$0xff]   ;;  %v4797_v5 = vld [vmem:[%s7441_s1 + $0x2c] ss:$16 sps:$4 sm:$0xff]  }
   0x3   :  { %3180 = vmatpush1.bf16.msra.mxu0 %v4793_v2  ;;  %3508 = vmatpush1.bf16.msra.mxu1 %v4794_v3  ;;  %v4799_v6 = vld [vmem:[%s7441_s1 + $0x20] ss:$16 sps:$4 sm:$0xff]   ;;  %v4800_v7 = vld [vmem:[%s7441_s1 + $0x28] ss:$16 sps:$4 sm:$0xff]   ;;  %v4801_v8 = vld [vmem:[%s7441_s1 + $0x44] ss:$16 sps:$4 sm:$0xff]  }
   0x4   :  { %3181 = vmatprep.subr.bf16.mxu0 %v4795_v4  ;;  %3509 = vmatprep.subr.bf16.mxu1 %v4797_v5  ;;  %v4803_v9 = vld [vmem:[%s7441_s1 + $0x4c] ss:$16 sps:$4 sm:$0xff]   ;;  %v4805_v10 = vld [vmem:[%s7441_s1 + $0x40] ss:$16 sps:$4 sm:$0xff]   ;;  %v4806_v11 = vld [vmem:[%s7441_s1 + $0x48] ss:$16 sps:$4 sm:$0xff]  }
   0x5   :  { %v4807_v12 = vld [vmem:[%s7441_s1 + $0x64] ss:$16 sps:$4 sm:$0xff]   ;;  %v4809_v13 = vld [vmem:[%s7441_s1 + $0x6c] ss:$16 sps:$4 sm:$0xff]   ;;  %v4811_v14 = vld [vmem:[%s7441_s1 + $0x60] ss:$16 sps:$4 sm:$0xff]  }
   0x6   :  { %v4812_v15 = vld [vmem:[%s7441_s1 + $0x68] ss:$16 sps:$4 sm:$0xff]   ;;  %v4813_v16 = vld [vmem:[%s7441_s1 + $0x84] ss:$16 sps:$4 sm:$0xff]   ;;  %v4815_v17 = vld [vmem:[%s7441_s1 + $0x8c] ss:$16 sps:$4 sm:$0xff]  }
   0x7   :  { %3182 = vmatpush1.bf16.msra.mxu0 %v4799_v6  ;;  %3510 = vmatpush1.bf16.msra.mxu1 %v4800_v7  ;;  %v4817_v18 = vld [vmem:[%s7441_s1 + $0x80] ss:$16 sps:$4 sm:$0xff]   ;;  %v4818_v19 = vld [vmem:[%s7441_s1 + $0x88] ss:$16 sps:$4 sm:$0xff]   ;;  %v4819_v20 = vld [vmem:[%s7441_s1 + $0xa4] ss:$16 sps:$4 sm:$0xff]  }
   0x8   :  { %3183 = vmatprep.subr.bf16.mxu0 %v4801_v8  ;;  %3511 = vmatprep.subr.bf16.mxu1 %v4803_v9  ;;  %v4821_v21 = vld [vmem:[%s7441_s1 + $0xac] ss:$16 sps:$4 sm:$0xff]   ;;  %v4823_v22 = vld [vmem:[%s7441_s1 + $0xa0] ss:$16 sps:$4 sm:$0xff]   ;;  %v4824_v23 = vld [vmem:[%s7441_s1 + $0xa8] ss:$16 sps:$4 sm:$0xff]  }
   0x9   :  { %v4825_v24 = vld [vmem:[%s7441_s1 + $0xc4] ss:$16 sps:$4 sm:$0xff]   ;;  %v4827_v25 = vld [vmem:[%s7441_s1 + $0xcc] ss:$16 sps:$4 sm:$0xff]   ;;  %v4829_v26 = vld [vmem:[%s7441_s1 + $0xc0] ss:$16 sps:$4 sm:$0xff]  }
   0xa   :  { %v4830_v27 = vld [vmem:[%s7441_s1 + $0xc8] ss:$16 sps:$4 sm:$0xff]   ;;  %v4831_v28 = vld [vmem:[%s7441_s1 + $0xe4] ss:$16 sps:$4 sm:$0xff]   ;;  %v4833_v29 = vld [vmem:[%s7441_s1 + $0xec] ss:$16 sps:$4 sm:$0xff]  }
   0xb   :  { %3184 = vmatpush1.bf16.msra.mxu0 %v4805_v10  ;;  %3512 = vmatpush1.bf16.msra.mxu1 %v4806_v11  ;;  %v4835_v30 = vld [vmem:[%s7441_s1 + $0xe0] ss:$16 sps:$4 sm:$0xff]   ;;  %v4836_v31 = vld [vmem:[%s7441_s1 + $0xe8] ss:$16 sps:$4 sm:$0xff]   ;;  %v4837_v32 = vld [vmem:[%s7441_s1 + $0x104] ss:$16 sps:$4 sm:$0xff]  }
   0xc   :  { %3185 = vmatprep.subr.bf16.mxu0 %v4807_v12  ;;  %3513 = vmatprep.subr.bf16.mxu1 %v4809_v13  ;;  %v4839_v33 = vld [vmem:[%s7441_s1 + $0x10c] ss:$16 sps:$4 sm:$0xff]   ;;  %v4841_v34 = vld [vmem:[%s7441_s1 + $0x100] ss:$16 sps:$4 sm:$0xff]   ;;  %v4842_v35 = vld [vmem:[%s7441_s1 + $0x108] ss:$16 sps:$4 sm:$0xff]  }
   0xd   :  { %v4843_v36 = vld [vmem:[%s7441_s1 + $0x124] ss:$16 sps:$4 sm:$0xff]   ;;  %v4845_v37 = vld [vmem:[%s7441_s1 + $0x12c] ss:$16 sps:$4 sm:$0xff]   ;;  %v4847_v38 = vld [vmem:[%s7441_s1 + $0x120] ss:$16 sps:$4 sm:$0xff]  }
   0xe   :  { %v4848_v39 = vld [vmem:[%s7441_s1 + $0x128] ss:$16 sps:$4 sm:$0xff]   ;;  %v4849_v40 = vld [vmem:[%s7441_s1 + $0x144] ss:$16 sps:$4 sm:$0xff]   ;;  %v4851_v41 = vld [vmem:[%s7441_s1 + $0x14c] ss:$16 sps:$4 sm:$0xff]  }
   0xf   :  { %3186 = vmatpush1.bf16.msra.mxu0 %v4811_v14  ;;  %3514 = vmatpush1.bf16.msra.mxu1 %v4812_v15  ;;  %v4853_v42 = vld [vmem:[%s7441_s1 + $0x140] ss:$16 sps:$4 sm:$0xff]   ;;  %v4854_v43 = vld [vmem:[%s7441_s1 + $0x148] ss:$16 sps:$4 sm:$0xff]   ;;  %v4855_v44 = vld [vmem:[%s7441_s1 + $0x164] ss:$16 sps:$4 sm:$0xff]  }
  0x10   :  { %3187 = vmatprep.subr.bf16.mxu0 %v4813_v16  ;;  %3515 = vmatprep.subr.bf16.mxu1 %v4815_v17  ;;  %v4857_v45 = vld [vmem:[%s7441_s1 + $0x16c] ss:$16 sps:$4 sm:$0xff]   ;;  %v21_v46 = vld [vmem:[%s7440_s0] sm:$0xff]  ;;  %v4860_v49 = vld [vmem:[%s7441_s1 + $0x168] ss:$16 sps:$4 sm:$0xff]  }
  0x11   :  { %v4859_v47 = vld [vmem:[%s7441_s1 + $0x160] ss:$16 sps:$4 sm:$0xff]   ;;  %v4066_v48 = vcombine.high %v21_v46, %v21_v46  ;;  %v4861_v50 = vld [vmem:[%s7441_s1 + $0x184] ss:$16 sps:$4 sm:$0xff]   ;;  %v4863_v51 = vld [vmem:[%s7441_s1 + $0x18c] ss:$16 sps:$4 sm:$0xff]   ;;  %v4065_v4 = vcombine.low %v21_v46, %v21_v46 }
  0x12   :  { %v4865_v52 = vld [vmem:[%s7441_s1 + $0x180] ss:$16 sps:$4 sm:$0xff]   ;;  %v4866_v53 = vld [vmem:[%s7441_s1 + $0x188] ss:$16 sps:$4 sm:$0xff]   ;;  %v4867_v54 = vld [vmem:[%s7441_s1 + $0x1a4] ss:$16 sps:$4 sm:$0xff]  }
  0x13   :  { %3188 = vmatpush1.bf16.msra.mxu0 %v4817_v18  ;;  %3516 = vmatpush1.bf16.msra.mxu1 %v4818_v19  ;;  %v4869_v55 = vld [vmem:[%s7441_s1 + $0x1ac] ss:$16 sps:$4 sm:$0xff]   ;;  %v4871_v56 = vld [vmem:[%s7441_s1 + $0x1a0] ss:$16 sps:$4 sm:$0xff]   ;;  %v4872_v57 = vld [vmem:[%s7441_s1 + $0x1a8] ss:$16 sps:$4 sm:$0xff]  }
  0x14   :  { %3189 = vmatprep.subr.bf16.mxu0 %v4819_v20  ;;  %3517 = vmatprep.subr.bf16.mxu1 %v4821_v21  ;;  %v4873_v58 = vld [vmem:[%s7441_s1 + $0x1c4] ss:$16 sps:$4 sm:$0xff]   ;;  %v4875_v59 = vld [vmem:[%s7441_s1 + $0x1cc] ss:$16 sps:$4 sm:$0xff]   ;;  %v4877_v60 = vld [vmem:[%s7441_s1 + $0x1c0] ss:$16 sps:$4 sm:$0xff]  }
  0x15   :  { %3211 = vmatprep.mubr.bf16.mxu0 %v4066_v48  ;;  %3539 = vmatprep.mubr.bf16.mxu1 %v4066_v48  ;;  %v4878_v61 = vld [vmem:[%s7441_s1 + $0x1c8] ss:$16 sps:$4 sm:$0xff]   ;;  %v4879_v62 = vld [vmem:[%s7441_s1 + $0x1e4] ss:$16 sps:$4 sm:$0xff]   ;;  %v4881_v63 = vld [vmem:[%s7441_s1 + $0x1ec] ss:$16 sps:$4 sm:$0xff]  }
  0x16   :  { %v4883_v0 = vld [vmem:[%s7441_s1 + $0x1e0] ss:$16 sps:$4 sm:$0xff]   ;;  %v4884_v1 = vld [vmem:[%s7441_s1 + $0x1e8] ss:$16 sps:$4 sm:$0xff]   ;;  %v4889_v2 = vld [vmem:[%s7441_s1 + $0x204] ss:$16 sps:$4 sm:$0xff]  }
  0x17   :  { %3190 = vmatpush1.bf16.msra.mxu0 %v4823_v22  ;;  %3518 = vmatpush1.bf16.msra.mxu1 %v4824_v23  ;;  %v4892_v3 = vld [vmem:[%s7441_s1 + $0x20c] ss:$16 sps:$4 sm:$0xff]   ;;  %v4887_v5 = vld [vmem:[%s7441_s1 + $0x200] ss:$16 sps:$4 sm:$0xff]   ;;  %v4890_v6 = vld [vmem:[%s7441_s1 + $0x208] ss:$16 sps:$4 sm:$0xff]  }
  0x18   :  { %3191 = vmatprep.subr.bf16.mxu0 %v4825_v24  ;;  %3519 = vmatprep.subr.bf16.mxu1 %v4827_v25  ;;  %v4895_v7 = vld [vmem:[%s7441_s1 + $0x224] ss:$16 sps:$4 sm:$0xff]   ;;  %v4898_v8 = vld [vmem:[%s7441_s1 + $0x22c] ss:$16 sps:$4 sm:$0xff]   ;;  %v4893_v9 = vld [vmem:[%s7441_s1 + $0x220] ss:$16 sps:$4 sm:$0xff]  }
  0x19   :  { %v4896_v10 = vld [vmem:[%s7441_s1 + $0x228] ss:$16 sps:$4 sm:$0xff]   ;;  %v4901_v11 = vld [vmem:[%s7441_s1 + $0x244] ss:$16 sps:$4 sm:$0xff]   ;;  %v4904_v12 = vld [vmem:[%s7441_s1 + $0x24c] ss:$16 sps:$4 sm:$0xff]  }
  0x1a   :  { %v4899_v13 = vld [vmem:[%s7441_s1 + $0x240] ss:$16 sps:$4 sm:$0xff]   ;;  %v4902_v14 = vld [vmem:[%s7441_s1 + $0x248] ss:$16 sps:$4 sm:$0xff]   ;;  %v4907_v15 = vld [vmem:[%s7441_s1 + $0x264] ss:$16 sps:$4 sm:$0xff]  }
  0x1b   :  { %3192 = vmatpush1.bf16.msra.mxu0 %v4829_v26  ;;  %3520 = vmatpush1.bf16.msra.mxu1 %v4830_v27  ;;  %v4910_v16 = vld [vmem:[%s7441_s1 + $0x26c] ss:$16 sps:$4 sm:$0xff]   ;;  %v4905_v17 = vld [vmem:[%s7441_s1 + $0x260] ss:$16 sps:$4 sm:$0xff]   ;;  %v4908_v18 = vld [vmem:[%s7441_s1 + $0x268] ss:$16 sps:$4 sm:$0xff]  }
  0x1c   :  { %3193 = vmatprep.subr.bf16.mxu0 %v4831_v28  ;;  %3521 = vmatprep.subr.bf16.mxu1 %v4833_v29  ;;  %v4913_v19 = vld [vmem:[%s7441_s1 + $0x284] ss:$16 sps:$4 sm:$0xff]   ;;  %v4916_v20 = vld [vmem:[%s7441_s1 + $0x28c] ss:$16 sps:$4 sm:$0xff]   ;;  %v4911_v21 = vld [vmem:[%s7441_s1 + $0x280] ss:$16 sps:$4 sm:$0xff]  }
  0x1d   :  { %v4914_v22 = vld [vmem:[%s7441_s1 + $0x288] ss:$16 sps:$4 sm:$0xff]   ;;  %v4919_v23 = vld [vmem:[%s7441_s1 + $0x2a4] ss:$16 sps:$4 sm:$0xff]   ;;  %v4922_v24 = vld [vmem:[%s7441_s1 + $0x2ac] ss:$16 sps:$4 sm:$0xff]  }
  0x1e   :  { %v4917_v25 = vld [vmem:[%s7441_s1 + $0x2a0] ss:$16 sps:$4 sm:$0xff]   ;;  %v4920_v26 = vld [vmem:[%s7441_s1 + $0x2a8] ss:$16 sps:$4 sm:$0xff]   ;;  %v4925_v27 = vld [vmem:[%s7441_s1 + $0x2c4] ss:$16 sps:$4 sm:$0xff]  }
  0x1f   :  { %3194 = vmatpush1.bf16.msra.mxu0 %v4835_v30  ;;  %3522 = vmatpush1.bf16.msra.mxu1 %v4836_v31  ;;  %v4928_v28 = vld [vmem:[%s7441_s1 + $0x2cc] ss:$16 sps:$4 sm:$0xff]   ;;  %v4923_v31 = vld [vmem:[%s7441_s1 + $0x2c0] ss:$16 sps:$4 sm:$0xff]   ;;  %v4950_v48 = vld [vmem:[%s7441_s1 + $0x348] ss:$16 sps:$4 sm:$0xff]  }
  0x20   :  { %3195 = vmatprep.subr.bf16.mxu0 %v4837_v32  ;;  %3523 = vmatprep.subr.bf16.mxu1 %v4839_v33  ;;  %v5904_v29 = vld [vmem:[%s7440_s0 + $0x8] sm:$0xff]  ;;  %v4931_v33 = vld [vmem:[%s7441_s1 + $0x2e4] ss:$16 sps:$4 sm:$0xff]  }
  0x21   :  { %v4068_v30 = vcombine.high %v5904_v29, %v5904_v29  ;;  %v4926_v32 = vld [vmem:[%s7441_s1 + $0x2c8] ss:$16 sps:$4 sm:$0xff]   ;;  %v4952_v46 = vld [vmem:[%s7441_s1 + $0x34c] ss:$16 sps:$4 sm:$0xff]  }
  0x23   :  { %3196 = vmatpush1.bf16.msra.mxu0 %v4841_v34  ;;  %3524 = vmatpush1.bf16.msra.mxu1 %v4842_v35  ;;  %v4934_v34 = vld [vmem:[%s7441_s1 + $0x2ec] ss:$16 sps:$4 sm:$0xff]   ;;  %v4929_v35 = vld [vmem:[%s7441_s1 + $0x2e0] ss:$16 sps:$4 sm:$0xff]  }
  0x24   :  { %3197 = vmatprep.subr.bf16.mxu0 %v4843_v36  ;;  %3525 = vmatprep.subr.bf16.mxu1 %v4845_v37  ;;  %v4932_v36 = vld [vmem:[%s7441_s1 + $0x2e8] ss:$16 sps:$4 sm:$0xff]   ;;  %v4937_v37 = vld [vmem:[%s7441_s1 + $0x304] ss:$16 sps:$4 sm:$0xff]  }
  0x27   :  { %3198 = vmatpush1.bf16.msra.mxu0 %v4847_v38  ;;  %3526 = vmatpush1.bf16.msra.mxu1 %v4848_v39  ;;  %v4940_v38 = vld [vmem:[%s7441_s1 + $0x30c] ss:$16 sps:$4 sm:$0xff]   ;;  %v4935_v39 = vld [vmem:[%s7441_s1 + $0x300] ss:$16 sps:$4 sm:$0xff]  }
  0x28   :  { %3199 = vmatprep.subr.bf16.mxu0 %v4849_v40  ;;  %3527 = vmatprep.subr.bf16.mxu1 %v4851_v41  ;;  %v4938_v40 = vld [vmem:[%s7441_s1 + $0x308] ss:$16 sps:$4 sm:$0xff]   ;;  %v4943_v41 = vld [vmem:[%s7441_s1 + $0x324] ss:$16 sps:$4 sm:$0xff]  }
  0x2b   :  { %3200 = vmatpush1.bf16.msra.mxu0 %v4853_v42  ;;  %3528 = vmatpush1.bf16.msra.mxu1 %v4854_v43  ;;  %v4946_v42 = vld [vmem:[%s7441_s1 + $0x32c] ss:$16 sps:$4 sm:$0xff]   ;;  %v4941_v43 = vld [vmem:[%s7441_s1 + $0x320] ss:$16 sps:$4 sm:$0xff]  }
  0x2c   :  { %3201 = vmatprep.subr.bf16.mxu0 %v4855_v44  ;;  %3529 = vmatprep.subr.bf16.mxu1 %v4857_v45  ;;  %v4944_v44 = vld [vmem:[%s7441_s1 + $0x328] ss:$16 sps:$4 sm:$0xff]   ;;  %v4949_v45 = vld [vmem:[%s7441_s1 + $0x344] ss:$16 sps:$4 sm:$0xff]  }
  0x2f   :  { %3202 = vmatpush1.bf16.msra.mxu0 %v4859_v47  ;;  %3530 = vmatpush1.bf16.msra.mxu1 %v4860_v49  ;;  %v4947_v47 = vld [vmem:[%s7441_s1 + $0x340] ss:$16 sps:$4 sm:$0xff]   ;;  %v4955_v49 = vld [vmem:[%s7441_s1 + $0x364] ss:$16 sps:$4 sm:$0xff]  }
  0x30   :  { %3203 = vmatprep.subr.bf16.mxu0 %v4861_v50  ;;  %3531 = vmatprep.subr.bf16.mxu1 %v4863_v51  ;;  %v4958_v50 = vld [vmem:[%s7441_s1 + $0x36c] ss:$16 sps:$4 sm:$0xff]   ;;  %v4953_v51 = vld [vmem:[%s7441_s1 + $0x360] ss:$16 sps:$4 sm:$0xff]  }
  0x33   :  { %3204 = vmatpush1.bf16.msra.mxu0 %v4865_v52  ;;  %3532 = vmatpush1.bf16.msra.mxu1 %v4866_v53  ;;  %v4956_v52 = vld [vmem:[%s7441_s1 + $0x368] ss:$16 sps:$4 sm:$0xff]   ;;  %v4961_v53 = vld [vmem:[%s7441_s1 + $0x384] ss:$16 sps:$4 sm:$0xff]  }
  0x34   :  { %3205 = vmatprep.subr.bf16.mxu0 %v4867_v54  ;;  %3533 = vmatprep.subr.bf16.mxu1 %v4869_v55  ;;  %v4964_v54 = vld [vmem:[%s7441_s1 + $0x38c] ss:$16 sps:$4 sm:$0xff]   ;;  %v4959_v55 = vld [vmem:[%s7441_s1 + $0x380] ss:$16 sps:$4 sm:$0xff]  }
  0x37   :  { %3206 = vmatpush1.bf16.msra.mxu0 %v4871_v56  ;;  %3534 = vmatpush1.bf16.msra.mxu1 %v4872_v57  ;;  %v4962_v56 = vld [vmem:[%s7441_s1 + $0x388] ss:$16 sps:$4 sm:$0xff]   ;;  %v4967_v57 = vld [vmem:[%s7441_s1 + $0x3a4] ss:$16 sps:$4 sm:$0xff]  }
  0x38   :  { %3207 = vmatprep.subr.bf16.mxu0 %v4873_v58  ;;  %3535 = vmatprep.subr.bf16.mxu1 %v4875_v59  ;;  %v4970_v58 = vld [vmem:[%s7441_s1 + $0x3ac] ss:$16 sps:$4 sm:$0xff]   ;;  %v4965_v59 = vld [vmem:[%s7441_s1 + $0x3a0] ss:$16 sps:$4 sm:$0xff]  }
  0x3b   :  { %3208 = vmatpush1.bf16.msra.mxu0 %v4877_v60  ;;  %3536 = vmatpush1.bf16.msra.mxu1 %v4878_v61  ;;  %v4968_v60 = vld [vmem:[%s7441_s1 + $0x3a8] ss:$16 sps:$4 sm:$0xff]   ;;  %v4973_v61 = vld [vmem:[%s7441_s1 + $0x3c4] ss:$16 sps:$4 sm:$0xff]  }
  0x3c   :  { %3209 = vmatprep.subr.bf16.mxu0 %v4879_v62  ;;  %3537 = vmatprep.subr.bf16.mxu1 %v4881_v63  ;;  %v4976_v62 = vld [vmem:[%s7441_s1 + $0x3cc] ss:$16 sps:$4 sm:$0xff]   ;;  %v4971_v63 = vld [vmem:[%s7441_s1 + $0x3c0] ss:$16 sps:$4 sm:$0xff]  }
  0x3f   :  { %3210 = vmatpush1.bf16.msra.mxu0 %v4883_v0  ;;  %3538 = vmatpush1.bf16.msra.mxu1 %v4884_v1  ;;  %v4974_v0 = vld [vmem:[%s7441_s1 + $0x3c8] ss:$16 sps:$4 sm:$0xff]   ;;  %v4979_v1 = vld [vmem:[%s7441_s1 + $0x3e4] ss:$16 sps:$4 sm:$0xff]  }
  0x40   :  { %3220 = vmatprep.subr.bf16.mxu0 %v4889_v2  ;;  %3548 = vmatprep.subr.bf16.mxu1 %v4892_v3  ;;  %v4982_v2 = vld [vmem:[%s7441_s1 + $0x3ec] ss:$16 sps:$4 sm:$0xff]   ;;  %v4977_v3 = vld [vmem:[%s7441_s1 + $0x3e0] ss:$16 sps:$4 sm:$0xff]  }
  0x42   :  { %3212 = vmatmul.mubr.bf16.vlgmr.msra.gmra.mrb[0].mxu0 %v4065_v4  ;;  %3540 = vmatmul.mubr.bf16.vlgmr.msra.gmra.mrb[0].mxu1 %v4065_v4  ;;  %v4980_v4 = vld [vmem:[%s7441_s1 + $0x3e8] ss:$16 sps:$4 sm:$0xff]  }
  0x43   :  { %3221 = vmatpush1.bf16.msra.mxu0 %v4887_v5  ;;  %3549 = vmatpush1.bf16.msra.mxu1 %v4890_v6  ;;  %v4987_v5 = vld [vmem:[%s7441_s1 + $0x404] ss:$16 sps:$4 sm:$0xff]   ;;  %v4990_v6 = vld [vmem:[%s7441_s1 + $0x40c] ss:$16 sps:$4 sm:$0xff]  }
  0x44   :  { %3222 = vmatprep.subr.bf16.mxu0 %v4895_v7  ;;  %3550 = vmatprep.subr.bf16.mxu1 %v4898_v8  ;;  %v4067_v7 = vcombine.low %v5904_v29, %v5904_v29  ;;  %v4985_v8 = vld [vmem:[%s7441_s1 + $0x400] ss:$16 sps:$4 sm:$0xff]   ;;  %v5020_v29 = vld [vmem:[%s7441_s1 + $0x4ac] ss:$16 sps:$4 sm:$0xff]  }
  0x45   :  { %3252 = vmatprep.mubr.bf16.mxu0 %v4068_v30  ;;  %3580 = vmatprep.mubr.bf16.mxu1 %v4068_v30  ;;  %v5015_v30 = vld [vmem:[%s7441_s1 + $0x4a0] ss:$16 sps:$4 sm:$0xff]  }
  0x47   :  { %3223 = vmatpush1.bf16.msra.mxu0 %v4893_v9  ;;  %3551 = vmatpush1.bf16.msra.mxu1 %v4896_v10  ;;  %v4988_v9 = vld [vmem:[%s7441_s1 + $0x408] ss:$16 sps:$4 sm:$0xff]   ;;  %v4993_v10 = vld [vmem:[%s7441_s1 + $0x424] ss:$16 sps:$4 sm:$0xff]  }
  0x48   :  { %3224 = vmatprep.subr.bf16.mxu0 %v4901_v11  ;;  %3552 = vmatprep.subr.bf16.mxu1 %v4904_v12  ;;  %v6042_v11 = vld [vmem:[%s7440_s0 + $0x10] sm:$0xff]  ;;  %v4996_v12 = vld [vmem:[%s7441_s1 + $0x42c] ss:$16 sps:$4 sm:$0xff]  }
  0x4b   :  { %3225 = vmatpush1.bf16.msra.mxu0 %v4899_v13  ;;  %3553 = vmatpush1.bf16.msra.mxu1 %v4902_v14  ;;  %v4070_v13 = vcombine.high %v6042_v11, %v6042_v11  ;;  %v4991_v14 = vld [vmem:[%s7441_s1 + $0x420] ss:$16 sps:$4 sm:$0xff]  }
  0x4c   :  { %3226 = vmatprep.subr.bf16.mxu0 %v4907_v15  ;;  %3554 = vmatprep.subr.bf16.mxu1 %v4910_v16  ;;  %v4994_v15 = vld [vmem:[%s7441_s1 + $0x428] ss:$16 sps:$4 sm:$0xff]   ;;  %v4999_v16 = vld [vmem:[%s7441_s1 + $0x444] ss:$16 sps:$4 sm:$0xff]  }
  0x4f   :  { %3227 = vmatpush1.bf16.msra.mxu0 %v4905_v17  ;;  %3555 = vmatpush1.bf16.msra.mxu1 %v4908_v18  ;;  %v5002_v17 = vld [vmem:[%s7441_s1 + $0x44c] ss:$16 sps:$4 sm:$0xff]   ;;  %v4997_v18 = vld [vmem:[%s7441_s1 + $0x440] ss:$16 sps:$4 sm:$0xff]  }
  0x50   :  { %3228 = vmatprep.subr.bf16.mxu0 %v4913_v19  ;;  %3556 = vmatprep.subr.bf16.mxu1 %v4916_v20  ;;  %v5000_v19 = vld [vmem:[%s7441_s1 + $0x448] ss:$16 sps:$4 sm:$0xff]   ;;  %v5005_v20 = vld [vmem:[%s7441_s1 + $0x464] ss:$16 sps:$4 sm:$0xff]  }
  0x53   :  { %3229 = vmatpush1.bf16.msra.mxu0 %v4911_v21  ;;  %3557 = vmatpush1.bf16.msra.mxu1 %v4914_v22  ;;  %v5008_v21 = vld [vmem:[%s7441_s1 + $0x46c] ss:$16 sps:$4 sm:$0xff]   ;;  %v5003_v22 = vld [vmem:[%s7441_s1 + $0x460] ss:$16 sps:$4 sm:$0xff]  }
  0x54   :  { %3230 = vmatprep.subr.bf16.mxu0 %v4919_v23  ;;  %3558 = vmatprep.subr.bf16.mxu1 %v4922_v24  ;;  %v5006_v23 = vld [vmem:[%s7441_s1 + $0x468] ss:$16 sps:$4 sm:$0xff]   ;;  %v5011_v24 = vld [vmem:[%s7441_s1 + $0x484] ss:$16 sps:$4 sm:$0xff]  }
  0x57   :  { %3231 = vmatpush1.bf16.msra.mxu0 %v4917_v25  ;;  %3559 = vmatpush1.bf16.msra.mxu1 %v4920_v26  ;;  %v5014_v25 = vld [vmem:[%s7441_s1 + $0x48c] ss:$16 sps:$4 sm:$0xff]   ;;  %v5009_v26 = vld [vmem:[%s7441_s1 + $0x480] ss:$16 sps:$4 sm:$0xff]  }
  0x58   :  { %3232 = vmatprep.subr.bf16.mxu0 %v4925_v27  ;;  %3560 = vmatprep.subr.bf16.mxu1 %v4928_v28  ;;  %v5012_v27 = vld [vmem:[%s7441_s1 + $0x488] ss:$16 sps:$4 sm:$0xff]   ;;  %v5017_v28 = vld [vmem:[%s7441_s1 + $0x4a4] ss:$16 sps:$4 sm:$0xff]  }
  0x5b   :  { %3233 = vmatpush1.bf16.msra.mxu0 %v4923_v31  ;;  %3561 = vmatpush1.bf16.msra.mxu1 %v4926_v32  ;;  %v5018_v31 = vld [vmem:[%s7441_s1 + $0x4a8] ss:$16 sps:$4 sm:$0xff]   ;;  %v5023_v32 = vld [vmem:[%s7441_s1 + $0x4c4] ss:$16 sps:$4 sm:$0xff]  }
  0x5c   :  { %3234 = vmatprep.subr.bf16.mxu0 %v4931_v33  ;;  %3562 = vmatprep.subr.bf16.mxu1 %v4934_v34  ;;  %v5026_v33 = vld [vmem:[%s7441_s1 + $0x4cc] ss:$16 sps:$4 sm:$0xff]   ;;  %v5021_v34 = vld [vmem:[%s7441_s1 + $0x4c0] ss:$16 sps:$4 sm:$0xff]  }
  0x5f   :  { %3235 = vmatpush1.bf16.msra.mxu0 %v4929_v35  ;;  %3563 = vmatpush1.bf16.msra.mxu1 %v4932_v36  ;;  %v5024_v35 = vld [vmem:[%s7441_s1 + $0x4c8] ss:$16 sps:$4 sm:$0xff]   ;;  %v5029_v36 = vld [vmem:[%s7441_s1 + $0x4e4] ss:$16 sps:$4 sm:$0xff]  }
  0x60   :  { %3236 = vmatprep.subr.bf16.mxu0 %v4937_v37  ;;  %3564 = vmatprep.subr.bf16.mxu1 %v4940_v38  ;;  %v5032_v37 = vld [vmem:[%s7441_s1 + $0x4ec] ss:$16 sps:$4 sm:$0xff]   ;;  %v5027_v38 = vld [vmem:[%s7441_s1 + $0x4e0] ss:$16 sps:$4 sm:$0xff]  }
  0x63   :  { %3237 = vmatpush1.bf16.msra.mxu0 %v4935_v39  ;;  %3565 = vmatpush1.bf16.msra.mxu1 %v4938_v40  ;;  %v5030_v39 = vld [vmem:[%s7441_s1 + $0x4e8] ss:$16 sps:$4 sm:$0xff]   ;;  %v5035_v40 = vld [vmem:[%s7441_s1 + $0x504] ss:$16 sps:$4 sm:$0xff]  }
  0x64   :  { %3238 = vmatprep.subr.bf16.mxu0 %v4943_v41  ;;  %3566 = vmatprep.subr.bf16.mxu1 %v4946_v42  ;;  %v5038_v41 = vld [vmem:[%s7441_s1 + $0x50c] ss:$16 sps:$4 sm:$0xff]   ;;  %v5033_v42 = vld [vmem:[%s7441_s1 + $0x500] ss:$16 sps:$4 sm:$0xff]  }
  0x67   :  { %3239 = vmatpush1.bf16.msra.mxu0 %v4941_v43  ;;  %3567 = vmatpush1.bf16.msra.mxu1 %v4944_v44  ;;  %v5036_v43 = vld [vmem:[%s7441_s1 + $0x508] ss:$16 sps:$4 sm:$0xff]   ;;  %v5041_v44 = vld [vmem:[%s7441_s1 + $0x524] ss:$16 sps:$4 sm:$0xff]  }
  0x68   :  { %3240 = vmatprep.subr.bf16.mxu0 %v4949_v45  ;;  %3568 = vmatprep.subr.bf16.mxu1 %v4952_v46  ;;  %v5044_v45 = vld [vmem:[%s7441_s1 + $0x52c] ss:$16 sps:$4 sm:$0xff]   ;;  %v5039_v46 = vld [vmem:[%s7441_s1 + $0x520] ss:$16 sps:$4 sm:$0xff]  }
  0x6b   :  { %3241 = vmatpush1.bf16.msra.mxu0 %v4947_v47  ;;  %3569 = vmatpush1.bf16.msra.mxu1 %v4950_v48  ;;  %v5042_v47 = vld [vmem:[%s7441_s1 + $0x528] ss:$16 sps:$4 sm:$0xff]   ;;  %v5047_v48 = vld [vmem:[%s7441_s1 + $0x544] ss:$16 sps:$4 sm:$0xff]  }
  0x6c   :  { %3242 = vmatprep.subr.bf16.mxu0 %v4955_v49  ;;  %3570 = vmatprep.subr.bf16.mxu1 %v4958_v50  ;;  %v5050_v49 = vld [vmem:[%s7441_s1 + $0x54c] ss:$16 sps:$4 sm:$0xff]   ;;  %v5045_v50 = vld [vmem:[%s7441_s1 + $0x540] ss:$16 sps:$4 sm:$0xff]  }
  0x6f   :  { %3243 = vmatpush1.bf16.msra.mxu0 %v4953_v51  ;;  %3571 = vmatpush1.bf16.msra.mxu1 %v4956_v52  ;;  %v5048_v51 = vld [vmem:[%s7441_s1 + $0x548] ss:$16 sps:$4 sm:$0xff]   ;;  %v5053_v52 = vld [vmem:[%s7441_s1 + $0x564] ss:$16 sps:$4 sm:$0xff]  }
  0x70   :  { %3244 = vmatprep.subr.bf16.mxu0 %v4961_v53  ;;  %3572 = vmatprep.subr.bf16.mxu1 %v4964_v54  ;;  %v5056_v53 = vld [vmem:[%s7441_s1 + $0x56c] ss:$16 sps:$4 sm:$0xff]   ;;  %v5051_v54 = vld [vmem:[%s7441_s1 + $0x560] ss:$16 sps:$4 sm:$0xff]  }
  0x73   :  { %3245 = vmatpush1.bf16.msra.mxu0 %v4959_v55  ;;  %3573 = vmatpush1.bf16.msra.mxu1 %v4962_v56  ;;  %v5054_v55 = vld [vmem:[%s7441_s1 + $0x568] ss:$16 sps:$4 sm:$0xff]   ;;  %v5059_v56 = vld [vmem:[%s7441_s1 + $0x584] ss:$16 sps:$4 sm:$0xff]  }
  0x74   :  { %3246 = vmatprep.subr.bf16.mxu0 %v4967_v57  ;;  %3574 = vmatprep.subr.bf16.mxu1 %v4970_v58  ;;  %v5062_v57 = vld [vmem:[%s7441_s1 + $0x58c] ss:$16 sps:$4 sm:$0xff]   ;;  %v5057_v58 = vld [vmem:[%s7441_s1 + $0x580] ss:$16 sps:$4 sm:$0xff]  }
  0x77   :  { %3247 = vmatpush1.bf16.msra.mxu0 %v4965_v59  ;;  %3575 = vmatpush1.bf16.msra.mxu1 %v4968_v60  ;;  %v5060_v59 = vld [vmem:[%s7441_s1 + $0x588] ss:$16 sps:$4 sm:$0xff]   ;;  %v5065_v60 = vld [vmem:[%s7441_s1 + $0x5a4] ss:$16 sps:$4 sm:$0xff]  }
  0x78   :  { %3248 = vmatprep.subr.bf16.mxu0 %v4973_v61  ;;  %3576 = vmatprep.subr.bf16.mxu1 %v4976_v62  ;;  %v5068_v61 = vld [vmem:[%s7441_s1 + $0x5ac] ss:$16 sps:$4 sm:$0xff]   ;;  %v5063_v62 = vld [vmem:[%s7441_s1 + $0x5a0] ss:$16 sps:$4 sm:$0xff]  }
  0x7b   :  { %3249 = vmatpush1.bf16.msra.mxu0 %v4971_v63  ;;  %3577 = vmatpush1.bf16.msra.mxu1 %v4974_v0  ;;  %v5066_v63 = vld [vmem:[%s7441_s1 + $0x5a8] ss:$16 sps:$4 sm:$0xff]   ;;  %v5071_v0 = vld [vmem:[%s7441_s1 + $0x5c4] ss:$16 sps:$4 sm:$0xff]  }
  0x7c   :  { %3250 = vmatprep.subr.bf16.mxu0 %v4979_v1  ;;  %3578 = vmatprep.subr.bf16.mxu1 %v4982_v2  ;;  %v5074_v1 = vld [vmem:[%s7441_s1 + $0x5cc] ss:$16 sps:$4 sm:$0xff]   ;;  %v5069_v2 = vld [vmem:[%s7441_s1 + $0x5c0] ss:$16 sps:$4 sm:$0xff]  }
  0x7f   :  { %3251 = vmatpush1.bf16.msra.mxu0 %v4977_v3  ;;  %3579 = vmatpush1.bf16.msra.mxu1 %v4980_v4  ;;  %v5072_v3 = vld [vmem:[%s7441_s1 + $0x5c8] ss:$16 sps:$4 sm:$0xff]   ;;  %v5077_v4 = vld [vmem:[%s7441_s1 + $0x5e4] ss:$16 sps:$4 sm:$0xff]  }
  0x80   :  { %3261 = vmatprep.subr.bf16.mxu0 %v4987_v5  ;;  %3589 = vmatprep.subr.bf16.mxu1 %v4990_v6  ;;  %v5080_v5 = vld [vmem:[%s7441_s1 + $0x5ec] ss:$16 sps:$4 sm:$0xff]   ;;  %v5075_v6 = vld [vmem:[%s7441_s1 + $0x5e0] ss:$16 sps:$4 sm:$0xff]  }
  0x82   :  { %3253 = vmatmul.mubr.bf16.vlgmr.msra.gmra.mrb[0].mxu0 %v4067_v7  ;;  %3581 = vmatmul.mubr.bf16.vlgmr.msra.gmra.mrb[0].mxu1 %v4067_v7  ;;  %v5078_v7 = vld [vmem:[%s7441_s1 + $0x5e8] ss:$16 sps:$4 sm:$0xff]  }
  0x83   :  { %3262 = vmatpush1.bf16.msra.mxu0 %v4985_v8  ;;  %3590 = vmatpush1.bf16.msra.mxu1 %v4988_v9  ;;  %v5085_v8 = vld [vmem:[%s7441_s1 + $0x604] ss:$16 sps:$4 sm:$0xff]   ;;  %v5088_v9 = vld [vmem:[%s7441_s1 + $0x60c] ss:$16 sps:$4 sm:$0xff]  }
  0x84   :  { %3263 = vmatprep.subr.bf16.mxu0 %v4993_v10  ;;  %3591 = vmatprep.subr.bf16.mxu1 %v4996_v12  ;;  %v5083_v10 = vld [vmem:[%s7441_s1 + $0x600] ss:$16 sps:$4 sm:$0xff]   ;;  %v4069_v12 = vcombine.low %v6042_v11, %v6042_v11  ;;  %v5094_v11 = vld [vmem:[%s7441_s1 + $0x62c] ss:$16 sps:$4 sm:$0xff]  }
  0x85   :  { %3293 = vmatprep.mubr.bf16.mxu0 %v4070_v13  ;;  %3621 = vmatprep.mubr.bf16.mxu1 %v4070_v13  ;;  %v5086_v13 = vld [vmem:[%s7441_s1 + $0x608] ss:$16 sps:$4 sm:$0xff]  }
  0x87   :  { %3264 = vmatpush1.bf16.msra.mxu0 %v4991_v14  ;;  %3592 = vmatpush1.bf16.msra.mxu1 %v4994_v15  ;;  %v6240_v14 = vld [vmem:[%s7440_s0 + $0x18] sm:$0xff]  ;;  %v5091_v15 = vld [vmem:[%s7441_s1 + $0x624] ss:$16 sps:$4 sm:$0xff]  }
  0x88   :  { %3265 = vmatprep.subr.bf16.mxu0 %v4999_v16  ;;  %3593 = vmatprep.subr.bf16.mxu1 %v5002_v17  ;;  %v4072_v16 = vcombine.high %v6240_v14, %v6240_v14  ;;  %v5089_v17 = vld [vmem:[%s7441_s1 + $0x620] ss:$16 sps:$4 sm:$0xff]  }
  0x8b   :  { %3266 = vmatpush1.bf16.msra.mxu0 %v4997_v18  ;;  %3594 = vmatpush1.bf16.msra.mxu1 %v5000_v19  ;;  %v5092_v18 = vld [vmem:[%s7441_s1 + $0x628] ss:$16 sps:$4 sm:$0xff]   ;;  %v5097_v19 = vld [vmem:[%s7441_s1 + $0x644] ss:$16 sps:$4 sm:$0xff]  }
  0x8c   :  { %3267 = vmatprep.subr.bf16.mxu0 %v5005_v20  ;;  %3595 = vmatprep.subr.bf16.mxu1 %v5008_v21  ;;  %v5100_v20 = vld [vmem:[%s7441_s1 + $0x64c] ss:$16 sps:$4 sm:$0xff]   ;;  %v5095_v21 = vld [vmem:[%s7441_s1 + $0x640] ss:$16 sps:$4 sm:$0xff]  }
  0x8f   :  { %3268 = vmatpush1.bf16.msra.mxu0 %v5003_v22  ;;  %3596 = vmatpush1.bf16.msra.mxu1 %v5006_v23  ;;  %v5098_v22 = vld [vmem:[%s7441_s1 + $0x648] ss:$16 sps:$4 sm:$0xff]   ;;  %v5103_v23 = vld [vmem:[%s7441_s1 + $0x664] ss:$16 sps:$4 sm:$0xff]  }
  0x90   :  { %3269 = vmatprep.subr.bf16.mxu0 %v5011_v24  ;;  %3597 = vmatprep.subr.bf16.mxu1 %v5014_v25  ;;  %v5106_v24 = vld [vmem:[%s7441_s1 + $0x66c] ss:$16 sps:$4 sm:$0xff]   ;;  %v5101_v25 = vld [vmem:[%s7441_s1 + $0x660] ss:$16 sps:$4 sm:$0xff]  }
  0x93   :  { %3270 = vmatpush1.bf16.msra.mxu0 %v5009_v26  ;;  %3598 = vmatpush1.bf16.msra.mxu1 %v5012_v27  ;;  %v5104_v26 = vld [vmem:[%s7441_s1 + $0x668] ss:$16 sps:$4 sm:$0xff]   ;;  %v5109_v27 = vld [vmem:[%s7441_s1 + $0x684] ss:$16 sps:$4 sm:$0xff]  }
  0x94   :  { %3271 = vmatprep.subr.bf16.mxu0 %v5017_v28  ;;  %3599 = vmatprep.subr.bf16.mxu1 %v5020_v29  ;;  %v5112_v28 = vld [vmem:[%s7441_s1 + $0x68c] ss:$16 sps:$4 sm:$0xff]   ;;  %v5107_v29 = vld [vmem:[%s7441_s1 + $0x680] ss:$16 sps:$4 sm:$0xff]  }
  0x97   :  { %3272 = vmatpush1.bf16.msra.mxu0 %v5015_v30  ;;  %3600 = vmatpush1.bf16.msra.mxu1 %v5018_v31  ;;  %v5110_v30 = vld [vmem:[%s7441_s1 + $0x688] ss:$16 sps:$4 sm:$0xff]   ;;  %v5115_v31 = vld [vmem:[%s7441_s1 + $0x6a4] ss:$16 sps:$4 sm:$0xff]  }
  0x98   :  { %3273 = vmatprep.subr.bf16.mxu0 %v5023_v32  ;;  %3601 = vmatprep.subr.bf16.mxu1 %v5026_v33  ;;  %v5118_v32 = vld [vmem:[%s7441_s1 + $0x6ac] ss:$16 sps:$4 sm:$0xff]   ;;  %v5113_v33 = vld [vmem:[%s7441_s1 + $0x6a0] ss:$16 sps:$4 sm:$0xff]  }
  0x9b   :  { %3274 = vmatpush1.bf16.msra.mxu0 %v5021_v34  ;;  %3602 = vmatpush1.bf16.msra.mxu1 %v5024_v35  ;;  %v5116_v34 = vld [vmem:[%s7441_s1 + $0x6a8] ss:$16 sps:$4 sm:$0xff]   ;;  %v5121_v35 = vld [vmem:[%s7441_s1 + $0x6c4] ss:$16 sps:$4 sm:$0xff]  }
  0x9c   :  { %3275 = vmatprep.subr.bf16.mxu0 %v5029_v36  ;;  %3603 = vmatprep.subr.bf16.mxu1 %v5032_v37  ;;  %v5124_v36 = vld [vmem:[%s7441_s1 + $0x6cc] ss:$16 sps:$4 sm:$0xff]   ;;  %v5119_v37 = vld [vmem:[%s7441_s1 + $0x6c0] ss:$16 sps:$4 sm:$0xff]  }
  0x9f   :  { %3276 = vmatpush1.bf16.msra.mxu0 %v5027_v38  ;;  %3604 = vmatpush1.bf16.msra.mxu1 %v5030_v39  ;;  %v5122_v38 = vld [vmem:[%s7441_s1 + $0x6c8] ss:$16 sps:$4 sm:$0xff]   ;;  %v5127_v39 = vld [vmem:[%s7441_s1 + $0x6e4] ss:$16 sps:$4 sm:$0xff]  }
  0xa0   :  { %3277 = vmatprep.subr.bf16.mxu0 %v5035_v40  ;;  %3605 = vmatprep.subr.bf16.mxu1 %v5038_v41  ;;  %v5130_v40 = vld [vmem:[%s7441_s1 + $0x6ec] ss:$16 sps:$4 sm:$0xff]   ;;  %v5125_v41 = vld [vmem:[%s7441_s1 + $0x6e0] ss:$16 sps:$4 sm:$0xff]  }
  0xa3   :  { %3278 = vmatpush1.bf16.msra.mxu0 %v5033_v42  ;;  %3606 = vmatpush1.bf16.msra.mxu1 %v5036_v43  ;;  %v5128_v42 = vld [vmem:[%s7441_s1 + $0x6e8] ss:$16 sps:$4 sm:$0xff]   ;;  %v5133_v43 = vld [vmem:[%s7441_s1 + $0x704] ss:$16 sps:$4 sm:$0xff]  }
  0xa4   :  { %3279 = vmatprep.subr.bf16.mxu0 %v5041_v44  ;;  %3607 = vmatprep.subr.bf16.mxu1 %v5044_v45  ;;  %v5136_v44 = vld [vmem:[%s7441_s1 + $0x70c] ss:$16 sps:$4 sm:$0xff]   ;;  %v5131_v45 = vld [vmem:[%s7441_s1 + $0x700] ss:$16 sps:$4 sm:$0xff]  }
  0xa7   :  { %3280 = vmatpush1.bf16.msra.mxu0 %v5039_v46  ;;  %3608 = vmatpush1.bf16.msra.mxu1 %v5042_v47  ;;  %v5134_v46 = vld [vmem:[%s7441_s1 + $0x708] ss:$16 sps:$4 sm:$0xff]   ;;  %v5139_v47 = vld [vmem:[%s7441_s1 + $0x724] ss:$16 sps:$4 sm:$0xff]  }
  0xa8   :  { %3281 = vmatprep.subr.bf16.mxu0 %v5047_v48  ;;  %3609 = vmatprep.subr.bf16.mxu1 %v5050_v49  ;;  %v5142_v48 = vld [vmem:[%s7441_s1 + $0x72c] ss:$16 sps:$4 sm:$0xff]   ;;  %v5137_v49 = vld [vmem:[%s7441_s1 + $0x720] ss:$16 sps:$4 sm:$0xff]  }
  0xab   :  { %3282 = vmatpush1.bf16.msra.mxu0 %v5045_v50  ;;  %3610 = vmatpush1.bf16.msra.mxu1 %v5048_v51  ;;  %v5140_v50 = vld [vmem:[%s7441_s1 + $0x728] ss:$16 sps:$4 sm:$0xff]   ;;  %v5145_v51 = vld [vmem:[%s7441_s1 + $0x744] ss:$16 sps:$4 sm:$0xff]  }
  0xac   :  { %3283 = vmatprep.subr.bf16.mxu0 %v5053_v52  ;;  %3611 = vmatprep.subr.bf16.mxu1 %v5056_v53  ;;  %v5148_v52 = vld [vmem:[%s7441_s1 + $0x74c] ss:$16 sps:$4 sm:$0xff]   ;;  %v5143_v53 = vld [vmem:[%s7441_s1 + $0x740] ss:$16 sps:$4 sm:$0xff]  }
  0xaf   :  { %3284 = vmatpush1.bf16.msra.mxu0 %v5051_v54  ;;  %3612 = vmatpush1.bf16.msra.mxu1 %v5054_v55  ;;  %v5146_v54 = vld [vmem:[%s7441_s1 + $0x748] ss:$16 sps:$4 sm:$0xff]   ;;  %v5151_v55 = vld [vmem:[%s7441_s1 + $0x764] ss:$16 sps:$4 sm:$0xff]  }
  0xb0   :  { %3285 = vmatprep.subr.bf16.mxu0 %v5059_v56  ;;  %3613 = vmatprep.subr.bf16.mxu1 %v5062_v57  ;;  %v5154_v56 = vld [vmem:[%s7441_s1 + $0x76c] ss:$16 sps:$4 sm:$0xff]   ;;  %v5149_v57 = vld [vmem:[%s7441_s1 + $0x760] ss:$16 sps:$4 sm:$0xff]  }
  0xb3   :  { %3286 = vmatpush1.bf16.msra.mxu0 %v5057_v58  ;;  %3614 = vmatpush1.bf16.msra.mxu1 %v5060_v59  ;;  %v5152_v58 = vld [vmem:[%s7441_s1 + $0x768] ss:$16 sps:$4 sm:$0xff]   ;;  %v5157_v59 = vld [vmem:[%s7441_s1 + $0x784] ss:$16 sps:$4 sm:$0xff]  }
  0xb4   :  { %3287 = vmatprep.subr.bf16.mxu0 %v5065_v60  ;;  %3615 = vmatprep.subr.bf16.mxu1 %v5068_v61  ;;  %v5160_v60 = vld [vmem:[%s7441_s1 + $0x78c] ss:$16 sps:$4 sm:$0xff]   ;;  %v5155_v61 = vld [vmem:[%s7441_s1 + $0x780] ss:$16 sps:$4 sm:$0xff]  }
  0xb7   :  { %3288 = vmatpush1.bf16.msra.mxu0 %v5063_v62  ;;  %3616 = vmatpush1.bf16.msra.mxu1 %v5066_v63  ;;  %v5158_v62 = vld [vmem:[%s7441_s1 + $0x788] ss:$16 sps:$4 sm:$0xff]   ;;  %v5163_v63 = vld [vmem:[%s7441_s1 + $0x7a4] ss:$16 sps:$4 sm:$0xff]  }
  0xb8   :  { %3289 = vmatprep.subr.bf16.mxu0 %v5071_v0  ;;  %3617 = vmatprep.subr.bf16.mxu1 %v5074_v1  ;;  %v5166_v0 = vld [vmem:[%s7441_s1 + $0x7ac] ss:$16 sps:$4 sm:$0xff]   ;;  %v5161_v1 = vld [vmem:[%s7441_s1 + $0x7a0] ss:$16 sps:$4 sm:$0xff]  }
  0xbb   :  { %3290 = vmatpush1.bf16.msra.mxu0 %v5069_v2  ;;  %3618 = vmatpush1.bf16.msra.mxu1 %v5072_v3  ;;  %v5164_v2 = vld [vmem:[%s7441_s1 + $0x7a8] ss:$16 sps:$4 sm:$0xff]   ;;  %v5169_v3 = vld [vmem:[%s7441_s1 + $0x7c4] ss:$16 sps:$4 sm:$0xff]  }
  0xbc   :  { %3291 = vmatprep.subr.bf16.mxu0 %v5077_v4  ;;  %3619 = vmatprep.subr.bf16.mxu1 %v5080_v5  ;;  %v5172_v4 = vld [vmem:[%s7441_s1 + $0x7cc] ss:$16 sps:$4 sm:$0xff]   ;;  %v5167_v5 = vld [vmem:[%s7441_s1 + $0x7c0] ss:$16 sps:$4 sm:$0xff]  }
  0xbf   :  { %3292 = vmatpush1.bf16.msra.mxu0 %v5075_v6  ;;  %3620 = vmatpush1.bf16.msra.mxu1 %v5078_v7  ;;  %v5170_v6 = vld [vmem:[%s7441_s1 + $0x7c8] ss:$16 sps:$4 sm:$0xff]   ;;  %v5175_v7 = vld [vmem:[%s7441_s1 + $0x7e4] ss:$16 sps:$4 sm:$0xff]  }
  0xc0   :  { %3302 = vmatprep.subr.bf16.mxu0 %v5085_v8  ;;  %3630 = vmatprep.subr.bf16.mxu1 %v5088_v9  ;;  %v5178_v8 = vld [vmem:[%s7441_s1 + $0x7ec] ss:$16 sps:$4 sm:$0xff]   ;;  %v5173_v9 = vld [vmem:[%s7441_s1 + $0x7e0] ss:$16 sps:$4 sm:$0xff]  }
  0xc2   :  { %3294 = vmatmul.mubr.bf16.vlgmr.msra.gmra.mrb[0].mxu0 %v4069_v12  ;;  %3622 = vmatmul.mubr.bf16.vlgmr.msra.gmra.mrb[0].mxu1 %v4069_v12  ;;  %v5183_v12 = vld [vmem:[%s7441_s1 + $0x804] ss:$16 sps:$4 sm:$0xff]  }
  0xc3   :  { %3303 = vmatpush1.bf16.msra.mxu0 %v5083_v10  ;;  %3631 = vmatpush1.bf16.msra.mxu1 %v5086_v13  ;;  %v5176_v10 = vld [vmem:[%s7441_s1 + $0x7e8] ss:$16 sps:$4 sm:$0xff]   ;;  %v5186_v13 = vld [vmem:[%s7441_s1 + $0x80c] ss:$16 sps:$4 sm:$0xff]  }
  0xc4   :  { %3304 = vmatprep.subr.bf16.mxu0 %v5091_v15  ;;  %3632 = vmatprep.subr.bf16.mxu1 %v5094_v11  ;;  %v5181_v15 = vld [vmem:[%s7441_s1 + $0x800] ss:$16 sps:$4 sm:$0xff]   ;;  %v4071_v11 = vcombine.low %v6240_v14, %v6240_v14  ;;  %v5192_v14 = vld [vmem:[%s7441_s1 + $0x82c] ss:$16 sps:$4 sm:$0xff]  }
  0xc5   :  { %3334 = vmatprep.mubr.bf16.mxu0 %v4072_v16  ;;  %3662 = vmatprep.mubr.bf16.mxu1 %v4072_v16  ;;  %v6438_v16 = vld [vmem:[%s7440_s0 + $0x20] sm:$0xff] }
  0xc7   :  { %3305 = vmatpush1.bf16.msra.mxu0 %v5089_v17  ;;  %3633 = vmatpush1.bf16.msra.mxu1 %v5092_v18  ;;  %v5184_v17 = vld [vmem:[%s7441_s1 + $0x808] ss:$16 sps:$4 sm:$0xff]   ;;  %v5189_v18 = vld [vmem:[%s7441_s1 + $0x824] ss:$16 sps:$4 sm:$0xff]  }
  0xc8   :  { %3306 = vmatprep.subr.bf16.mxu0 %v5097_v19  ;;  %3634 = vmatprep.subr.bf16.mxu1 %v5100_v20  ;;  %v4074_v19 = vcombine.high %v6438_v16, %v6438_v16  ;;  %v5187_v20 = vld [vmem:[%s7441_s1 + $0x820] ss:$16 sps:$4 sm:$0xff]  }
  0xcb   :  { %3307 = vmatpush1.bf16.msra.mxu0 %v5095_v21  ;;  %3635 = vmatpush1.bf16.msra.mxu1 %v5098_v22  ;;  %v5190_v21 = vld [vmem:[%s7441_s1 + $0x828] ss:$16 sps:$4 sm:$0xff]   ;;  %v5195_v22 = vld [vmem:[%s7441_s1 + $0x844] ss:$16 sps:$4 sm:$0xff]  }
  0xcc   :  { %3308 = vmatprep.subr.bf16.mxu0 %v5103_v23  ;;  %3636 = vmatprep.subr.bf16.mxu1 %v5106_v24  ;;  %v5198_v23 = vld [vmem:[%s7441_s1 + $0x84c] ss:$16 sps:$4 sm:$0xff]   ;;  %v5193_v24 = vld [vmem:[%s7441_s1 + $0x840] ss:$16 sps:$4 sm:$0xff]  }
  0xcf   :  { %3309 = vmatpush1.bf16.msra.mxu0 %v5101_v25  ;;  %3637 = vmatpush1.bf16.msra.mxu1 %v5104_v26  ;;  %v5196_v25 = vld [vmem:[%s7441_s1 + $0x848] ss:$16 sps:$4 sm:$0xff]   ;;  %v5201_v26 = vld [vmem:[%s7441_s1 + $0x864] ss:$16 sps:$4 sm:$0xff]  }
  0xd0   :  { %3310 = vmatprep.subr.bf16.mxu0 %v5109_v27  ;;  %3638 = vmatprep.subr.bf16.mxu1 %v5112_v28  ;;  %v5204_v27 = vld [vmem:[%s7441_s1 + $0x86c] ss:$16 sps:$4 sm:$0xff]   ;;  %v5199_v28 = vld [vmem:[%s7441_s1 + $0x860] ss:$16 sps:$4 sm:$0xff]  }
  0xd3   :  { %3311 = vmatpush1.bf16.msra.mxu0 %v5107_v29  ;;  %3639 = vmatpush1.bf16.msra.mxu1 %v5110_v30  ;;  %v5202_v29 = vld [vmem:[%s7441_s1 + $0x868] ss:$16 sps:$4 sm:$0xff]   ;;  %v5207_v30 = vld [vmem:[%s7441_s1 + $0x884] ss:$16 sps:$4 sm:$0xff]  }
  0xd4   :  { %3312 = vmatprep.subr.bf16.mxu0 %v5115_v31  ;;  %3640 = vmatprep.subr.bf16.mxu1 %v5118_v32  ;;  %v5210_v31 = vld [vmem:[%s7441_s1 + $0x88c] ss:$16 sps:$4 sm:$0xff]   ;;  %v5205_v32 = vld [vmem:[%s7441_s1 + $0x880] ss:$16 sps:$4 sm:$0xff]  }
  0xd7   :  { %3313 = vmatpush1.bf16.msra.mxu0 %v5113_v33  ;;  %3641 = vmatpush1.bf16.msra.mxu1 %v5116_v34  ;;  %v5208_v33 = vld [vmem:[%s7441_s1 + $0x888] ss:$16 sps:$4 sm:$0xff]   ;;  %v5213_v34 = vld [vmem:[%s7441_s1 + $0x8a4] ss:$16 sps:$4 sm:$0xff]  }
  0xd8   :  { %3314 = vmatprep.subr.bf16.mxu0 %v5121_v35  ;;  %3642 = vmatprep.subr.bf16.mxu1 %v5124_v36  ;;  %v5216_v35 = vld [vmem:[%s7441_s1 + $0x8ac] ss:$16 sps:$4 sm:$0xff]   ;;  %v5211_v36 = vld [vmem:[%s7441_s1 + $0x8a0] ss:$16 sps:$4 sm:$0xff]  }
  0xdb   :  { %3315 = vmatpush1.bf16.msra.mxu0 %v5119_v37  ;;  %3643 = vmatpush1.bf16.msra.mxu1 %v5122_v38  ;;  %v5214_v37 = vld [vmem:[%s7441_s1 + $0x8a8] ss:$16 sps:$4 sm:$0xff]   ;;  %v5219_v38 = vld [vmem:[%s7441_s1 + $0x8c4] ss:$16 sps:$4 sm:$0xff]  }
  0xdc   :  { %3316 = vmatprep.subr.bf16.mxu0 %v5127_v39  ;;  %3644 = vmatprep.subr.bf16.mxu1 %v5130_v40  ;;  %v5222_v39 = vld [vmem:[%s7441_s1 + $0x8cc] ss:$16 sps:$4 sm:$0xff]   ;;  %v5217_v40 = vld [vmem:[%s7441_s1 + $0x8c0] ss:$16 sps:$4 sm:$0xff]  }
  0xdf   :  { %3317 = vmatpush1.bf16.msra.mxu0 %v5125_v41  ;;  %3645 = vmatpush1.bf16.msra.mxu1 %v5128_v42  ;;  %v5220_v41 = vld [vmem:[%s7441_s1 + $0x8c8] ss:$16 sps:$4 sm:$0xff]   ;;  %v5225_v42 = vld [vmem:[%s7441_s1 + $0x8e4] ss:$16 sps:$4 sm:$0xff]  }
  0xe0   :  { %3318 = vmatprep.subr.bf16.mxu0 %v5133_v43  ;;  %3646 = vmatprep.subr.bf16.mxu1 %v5136_v44  ;;  %v5228_v43 = vld [vmem:[%s7441_s1 + $0x8ec] ss:$16 sps:$4 sm:$0xff]   ;;  %v5223_v44 = vld [vmem:[%s7441_s1 + $0x8e0] ss:$16 sps:$4 sm:$0xff]  }
  0xe3   :  { %3319 = vmatpush1.bf16.msra.mxu0 %v5131_v45  ;;  %3647 = vmatpush1.bf16.msra.mxu1 %v5134_v46  ;;  %v5226_v45 = vld [vmem:[%s7441_s1 + $0x8e8] ss:$16 sps:$4 sm:$0xff]   ;;  %v5231_v46 = vld [vmem:[%s7441_s1 + $0x904] ss:$16 sps:$4 sm:$0xff]  }
  0xe4   :  { %3320 = vmatprep.subr.bf16.mxu0 %v5139_v47  ;;  %3648 = vmatprep.subr.bf16.mxu1 %v5142_v48  ;;  %v5234_v47 = vld [vmem:[%s7441_s1 + $0x90c] ss:$16 sps:$4 sm:$0xff]   ;;  %v5229_v48 = vld [vmem:[%s7441_s1 + $0x900] ss:$16 sps:$4 sm:$0xff]  }
  0xe7   :  { %3321 = vmatpush1.bf16.msra.mxu0 %v5137_v49  ;;  %3649 = vmatpush1.bf16.msra.mxu1 %v5140_v50  ;;  %v5232_v49 = vld [vmem:[%s7441_s1 + $0x908] ss:$16 sps:$4 sm:$0xff]   ;;  %v5237_v50 = vld [vmem:[%s7441_s1 + $0x924] ss:$16 sps:$4 sm:$0xff]  }
  0xe8   :  { %3322 = vmatprep.subr.bf16.mxu0 %v5145_v51  ;;  %3650 = vmatprep.subr.bf16.mxu1 %v5148_v52  ;;  %v5240_v51 = vld [vmem:[%s7441_s1 + $0x92c] ss:$16 sps:$4 sm:$0xff]   ;;  %v5235_v52 = vld [vmem:[%s7441_s1 + $0x920] ss:$16 sps:$4 sm:$0xff]  }
  0xeb   :  { %3323 = vmatpush1.bf16.msra.mxu0 %v5143_v53  ;;  %3651 = vmatpush1.bf16.msra.mxu1 %v5146_v54  ;;  %v5238_v53 = vld [vmem:[%s7441_s1 + $0x928] ss:$16 sps:$4 sm:$0xff]   ;;  %v5243_v54 = vld [vmem:[%s7441_s1 + $0x944] ss:$16 sps:$4 sm:$0xff]  }
  0xec   :  { %3324 = vmatprep.subr.bf16.mxu0 %v5151_v55  ;;  %3652 = vmatprep.subr.bf16.mxu1 %v5154_v56  ;;  %v5246_v55 = vld [vmem:[%s7441_s1 + $0x94c] ss:$16 sps:$4 sm:$0xff]   ;;  %v5241_v56 = vld [vmem:[%s7441_s1 + $0x940] ss:$16 sps:$4 sm:$0xff]  }
  0xef   :  { %3325 = vmatpush1.bf16.msra.mxu0 %v5149_v57  ;;  %3653 = vmatpush1.bf16.msra.mxu1 %v5152_v58  ;;  %v5244_v57 = vld [vmem:[%s7441_s1 + $0x948] ss:$16 sps:$4 sm:$0xff]   ;;  %v5249_v58 = vld [vmem:[%s7441_s1 + $0x964] ss:$16 sps:$4 sm:$0xff]  }
  0xf0   :  { %3326 = vmatprep.subr.bf16.mxu0 %v5157_v59  ;;  %3654 = vmatprep.subr.bf16.mxu1 %v5160_v60  ;;  %v5252_v59 = vld [vmem:[%s7441_s1 + $0x96c] ss:$16 sps:$4 sm:$0xff]   ;;  %v5247_v60 = vld [vmem:[%s7441_s1 + $0x960] ss:$16 sps:$4 sm:$0xff]  }
  0xf3   :  { %3327 = vmatpush1.bf16.msra.mxu0 %v5155_v61  ;;  %3655 = vmatpush1.bf16.msra.mxu1 %v5158_v62  ;;  %v5250_v61 = vld [vmem:[%s7441_s1 + $0x968] ss:$16 sps:$4 sm:$0xff]   ;;  %v5255_v62 = vld [vmem:[%s7441_s1 + $0x984] ss:$16 sps:$4 sm:$0xff]  }
  0xf4   :  { %3328 = vmatprep.subr.bf16.mxu0 %v5163_v63  ;;  %3656 = vmatprep.subr.bf16.mxu1 %v5166_v0  ;;  %v5258_v63 = vld [vmem:[%s7441_s1 + $0x98c] ss:$16 sps:$4 sm:$0xff]   ;;  %v5253_v0 = vld [vmem:[%s7441_s1 + $0x980] ss:$16 sps:$4 sm:$0xff]  }
  0xf7   :  { %3329 = vmatpush1.bf16.msra.mxu0 %v5161_v1  ;;  %3657 = vmatpush1.bf16.msra.mxu1 %v5164_v2  ;;  %v5256_v1 = vld [vmem:[%s7441_s1 + $0x988] ss:$16 sps:$4 sm:$0xff]   ;;  %v5261_v2 = vld [vmem:[%s7441_s1 + $0x9a4] ss:$16 sps:$4 sm:$0xff]  }
  0xf8   :  { %3330 = vmatprep.subr.bf16.mxu0 %v5169_v3  ;;  %3658 = vmatprep.subr.bf16.mxu1 %v5172_v4  ;;  %v5264_v3 = vld [vmem:[%s7441_s1 + $0x9ac] ss:$16 sps:$4 sm:$0xff]   ;;  %v5259_v4 = vld [vmem:[%s7441_s1 + $0x9a0] ss:$16 sps:$4 sm:$0xff]  }
  0xfb   :  { %3331 = vmatpush1.bf16.msra.mxu0 %v5167_v5  ;;  %3659 = vmatpush1.bf16.msra.mxu1 %v5170_v6  ;;  %v5262_v5 = vld [vmem:[%s7441_s1 + $0x9a8] ss:$16 sps:$4 sm:$0xff]   ;;  %v5267_v6 = vld [vmem:[%s7441_s1 + $0x9c4] ss:$16 sps:$4 sm:$0xff]  }
  0xfc   :  { %3332 = vmatprep.subr.bf16.mxu0 %v5175_v7  ;;  %3660 = vmatprep.subr.bf16.mxu1 %v5178_v8  ;;  %v5270_v7 = vld [vmem:[%s7441_s1 + $0x9cc] ss:$16 sps:$4 sm:$0xff]   ;;  %v5265_v8 = vld [vmem:[%s7441_s1 + $0x9c0] ss:$16 sps:$4 sm:$0xff]  }
  0xff   :  { %3333 = vmatpush1.bf16.msra.mxu0 %v5173_v9  ;;  %3661 = vmatpush1.bf16.msra.mxu1 %v5176_v10  ;;  %v5268_v9 = vld [vmem:[%s7441_s1 + $0x9c8] ss:$16 sps:$4 sm:$0xff]   ;;  %v5273_v10 = vld [vmem:[%s7441_s1 + $0x9e4] ss:$16 sps:$4 sm:$0xff]  }
 0x100   :  { %3343 = vmatprep.subr.bf16.mxu0 %v5183_v12  ;;  %3671 = vmatprep.subr.bf16.mxu1 %v5186_v13  ;;  %v5276_v12 = vld [vmem:[%s7441_s1 + $0x9ec] ss:$16 sps:$4 sm:$0xff]   ;;  %v5271_v13 = vld [vmem:[%s7441_s1 + $0x9e0] ss:$16 sps:$4 sm:$0xff]  }
 0x102   :  { %3335 = vmatmul.mubr.bf16.vlgmr.msra.gmra.mrb[0].mxu0 %v4071_v11  ;;  %3663 = vmatmul.mubr.bf16.vlgmr.msra.gmra.mrb[0].mxu1 %v4071_v11  ;;  %v5281_v11 = vld [vmem:[%s7441_s1 + $0xa04] ss:$16 sps:$4 sm:$0xff]  }
 0x103   :  { %3344 = vmatpush1.bf16.msra.mxu0 %v5181_v15  ;;  %3672 = vmatpush1.bf16.msra.mxu1 %v5184_v17  ;;  %v5274_v15 = vld [vmem:[%s7441_s1 + $0x9e8] ss:$16 sps:$4 sm:$0xff]   ;;  %v5284_v17 = vld [vmem:[%s7441_s1 + $0xa0c] ss:$16 sps:$4 sm:$0xff]  }
 0x104   :  { %3345 = vmatprep.subr.bf16.mxu0 %v5189_v18  ;;  %3673 = vmatprep.subr.bf16.mxu1 %v5192_v14  ;;  %v6634_v18 = vld [vmem:[%s7440_s0 + $0x28] sm:$0xff]  ;;  %v4073_v14 = vcombine.low %v6438_v16, %v6438_v16 }
 0x105   :  { %3375 = vmatprep.mubr.bf16.mxu0 %v4074_v19  ;;  %3703 = vmatprep.mubr.bf16.mxu1 %v4074_v19  ;;  %v5279_v19 = vld [vmem:[%s7441_s1 + $0xa00] ss:$16 sps:$4 sm:$0xff]   ;;  %v5290_v16 = vld [vmem:[%s7441_s1 + $0xa2c] ss:$16 sps:$4 sm:$0xff]  }
 0x107   :  { %3346 = vmatpush1.bf16.msra.mxu0 %v5187_v20  ;;  %3674 = vmatpush1.bf16.msra.mxu1 %v5190_v21  ;;  %v5282_v20 = vld [vmem:[%s7441_s1 + $0xa08] ss:$16 sps:$4 sm:$0xff]   ;;  %v5287_v21 = vld [vmem:[%s7441_s1 + $0xa24] ss:$16 sps:$4 sm:$0xff]  }
 0x108   :  { %3347 = vmatprep.subr.bf16.mxu0 %v5195_v22  ;;  %3675 = vmatprep.subr.bf16.mxu1 %v5198_v23  ;;  %v4076_v22 = vcombine.high %v6634_v18, %v6634_v18 }
 0x10b   :  { %3348 = vmatpush1.bf16.msra.mxu0 %v5193_v24  ;;  %3676 = vmatpush1.bf16.msra.mxu1 %v5196_v25 }
 0x10c   :  { %3349 = vmatprep.subr.bf16.mxu0 %v5201_v26  ;;  %3677 = vmatprep.subr.bf16.mxu1 %v5204_v27 }
 0x10f   :  { %3350 = vmatpush1.bf16.msra.mxu0 %v5199_v28  ;;  %3678 = vmatpush1.bf16.msra.mxu1 %v5202_v29 }
 0x110   :  { %3351 = vmatprep.subr.bf16.mxu0 %v5207_v30  ;;  %3679 = vmatprep.subr.bf16.mxu1 %v5210_v31 }
 0x113   :  { %3352 = vmatpush1.bf16.msra.mxu0 %v5205_v32  ;;  %3680 = vmatpush1.bf16.msra.mxu1 %v5208_v33 }
 0x114   :  { %3353 = vmatprep.subr.bf16.mxu0 %v5213_v34  ;;  %3681 = vmatprep.subr.bf16.mxu1 %v5216_v35 }
 0x117   :  { %3354 = vmatpush1.bf16.msra.mxu0 %v5211_v36  ;;  %3682 = vmatpush1.bf16.msra.mxu1 %v5214_v37 }
 0x118   :  { %3355 = vmatprep.subr.bf16.mxu0 %v5219_v38  ;;  %3683 = vmatprep.subr.bf16.mxu1 %v5222_v39 }
 0x11b   :  { %3356 = vmatpush1.bf16.msra.mxu0 %v5217_v40  ;;  %3684 = vmatpush1.bf16.msra.mxu1 %v5220_v41 }
 0x11c   :  { %3357 = vmatprep.subr.bf16.mxu0 %v5225_v42  ;;  %3685 = vmatprep.subr.bf16.mxu1 %v5228_v43 }
 0x11f   :  { %3358 = vmatpush1.bf16.msra.mxu0 %v5223_v44  ;;  %3686 = vmatpush1.bf16.msra.mxu1 %v5226_v45 }
 0x120   :  { %3359 = vmatprep.subr.bf16.mxu0 %v5231_v46  ;;  %3687 = vmatprep.subr.bf16.mxu1 %v5234_v47 }
 0x123   :  { %3360 = vmatpush1.bf16.msra.mxu0 %v5229_v48  ;;  %3688 = vmatpush1.bf16.msra.mxu1 %v5232_v49 }
 0x124   :  { %3361 = vmatprep.subr.bf16.mxu0 %v5237_v50  ;;  %3689 = vmatprep.subr.bf16.mxu1 %v5240_v51 }
 0x127   :  { %3362 = vmatpush1.bf16.msra.mxu0 %v5235_v52  ;;  %3690 = vmatpush1.bf16.msra.mxu1 %v5238_v53 }
 0x128   :  { %3363 = vmatprep.subr.bf16.mxu0 %v5243_v54  ;;  %3691 = vmatprep.subr.bf16.mxu1 %v5246_v55 }
 0x12b   :  { %3364 = vmatpush1.bf16.msra.mxu0 %v5241_v56  ;;  %3692 = vmatpush1.bf16.msra.mxu1 %v5244_v57 }
 0x12c   :  { %3365 = vmatprep.subr.bf16.mxu0 %v5249_v58  ;;  %3693 = vmatprep.subr.bf16.mxu1 %v5252_v59 }
 0x12f   :  { %3366 = vmatpush1.bf16.msra.mxu0 %v5247_v60  ;;  %3694 = vmatpush1.bf16.msra.mxu1 %v5250_v61 }
 0x130   :  { %3367 = vmatprep.subr.bf16.mxu0 %v5255_v62  ;;  %3695 = vmatprep.subr.bf16.mxu1 %v5258_v63 }
 0x133   :  { %3368 = vmatpush1.bf16.msra.mxu0 %v5253_v0  ;;  %3696 = vmatpush1.bf16.msra.mxu1 %v5256_v1 }
 0x134   :  { %3369 = vmatprep.subr.bf16.mxu0 %v5261_v2  ;;  %3697 = vmatprep.subr.bf16.mxu1 %v5264_v3 }
 0x137   :  { %3370 = vmatpush1.bf16.msra.mxu0 %v5259_v4  ;;  %3698 = vmatpush1.bf16.msra.mxu1 %v5262_v5 }
 0x138   :  { %3371 = vmatprep.subr.bf16.mxu0 %v5267_v6  ;;  %3699 = vmatprep.subr.bf16.mxu1 %v5270_v7 }
 0x13b   :  { %3372 = vmatpush1.bf16.msra.mxu0 %v5265_v8  ;;  %3700 = vmatpush1.bf16.msra.mxu1 %v5268_v9 }
 0x13c   :  { %3373 = vmatprep.subr.bf16.mxu0 %v5273_v10  ;;  %3701 = vmatprep.subr.bf16.mxu1 %v5276_v12 }
 0x13f   :  { %3374 = vmatpush1.bf16.msra.mxu0 %v5271_v13  ;;  %3702 = vmatpush1.bf16.msra.mxu1 %v5274_v15 }
 0x140   :  { %3384 = vmatprep.subr.bf16.mxu0 %v5281_v11  ;;  %3712 = vmatprep.subr.bf16.mxu1 %v5284_v17 }
 0x142   :  { %3376 = vmatmul.mubr.bf16.vlgmr.msra.gmra.mrb[0].mxu0 %v4073_v14  ;;  %3704 = vmatmul.mubr.bf16.vlgmr.msra.gmra.mrb[0].mxu1 %v4073_v14 }
 0x143   :  { %10 = vsyncpa [#allocation3], 0  ;;  %3385 = vmatpush1.bf16.msra.mxu0 %v5279_v19  ;;  %3713 = vmatpush1.bf16.msra.mxu1 %v5282_v20  ;;  %v5285_v23 = vld [vmem:[%s7441_s1 + $0xa20] ss:$16 sps:$4 sm:$0xff]   ;;  %v5288_v24 = vld [vmem:[%s7441_s1 + $0xa28] ss:$16 sps:$4 sm:$0xff]  }
 0x144   :  { %3386 = vmatprep.subr.bf16.mxu0 %v5287_v21  ;;  %3714 = vmatprep.subr.bf16.mxu1 %v5290_v16  ;;  %v5293_v25 = vld [vmem:[%s7441_s1 + $0xa44] ss:$16 sps:$4 sm:$0xff]   ;;  %v5296_v26 = vld [vmem:[%s7441_s1 + $0xa4c] ss:$16 sps:$4 sm:$0xff]   ;;  %v5291_v27 = vld [vmem:[%s7441_s1 + $0xa40] ss:$16 sps:$4 sm:$0xff]   ;;  %v4075_v21 = vcombine.low %v6634_v18, %v6634_v18 }
 0x145   :  { %3416 = vmatprep.mubr.bf16.mxu0 %v4076_v22  ;;  %3744 = vmatprep.mubr.bf16.mxu1 %v4076_v22  ;;  %v5294_v28 = vld [vmem:[%s7441_s1 + $0xa48] ss:$16 sps:$4 sm:$0xff]   ;;  %v5299_v29 = vld [vmem:[%s7441_s1 + $0xa64] ss:$16 sps:$4 sm:$0xff]   ;;  %v5302_v30 = vld [vmem:[%s7441_s1 + $0xa6c] ss:$16 sps:$4 sm:$0xff]  }
 0x146   :  { %v5297_v31 = vld [vmem:[%s7441_s1 + $0xa60] ss:$16 sps:$4 sm:$0xff]   ;;  %v5300_v32 = vld [vmem:[%s7441_s1 + $0xa68] ss:$16 sps:$4 sm:$0xff]   ;;  %v5305_v33 = vld [vmem:[%s7441_s1 + $0xa84] ss:$16 sps:$4 sm:$0xff]  }
 0x147   :  { %3387 = vmatpush1.bf16.msra.mxu0 %v5285_v23  ;;  %3715 = vmatpush1.bf16.msra.mxu1 %v5288_v24  ;;  %v5308_v34 = vld [vmem:[%s7441_s1 + $0xa8c] ss:$16 sps:$4 sm:$0xff]   ;;  %v5303_v35 = vld [vmem:[%s7441_s1 + $0xa80] ss:$16 sps:$4 sm:$0xff]   ;;  %v5306_v36 = vld [vmem:[%s7441_s1 + $0xa88] ss:$16 sps:$4 sm:$0xff]  }
 0x148   :  { %3388 = vmatprep.subr.bf16.mxu0 %v5293_v25  ;;  %3716 = vmatprep.subr.bf16.mxu1 %v5296_v26  ;;  %v5311_v37 = vld [vmem:[%s7441_s1 + $0xaa4] ss:$16 sps:$4 sm:$0xff]   ;;  %v5314_v38 = vld [vmem:[%s7441_s1 + $0xaac] ss:$16 sps:$4 sm:$0xff]   ;;  %v5309_v39 = vld [vmem:[%s7441_s1 + $0xaa0] ss:$16 sps:$4 sm:$0xff]  }
 0x149   :  { %v5312_v40 = vld [vmem:[%s7441_s1 + $0xaa8] ss:$16 sps:$4 sm:$0xff]   ;;  %v5317_v41 = vld [vmem:[%s7441_s1 + $0xac4] ss:$16 sps:$4 sm:$0xff]   ;;  %v5320_v42 = vld [vmem:[%s7441_s1 + $0xacc] ss:$16 sps:$4 sm:$0xff]  }
 0x14a   :  { %v5315_v43 = vld [vmem:[%s7441_s1 + $0xac0] ss:$16 sps:$4 sm:$0xff]   ;;  %v5318_v44 = vld [vmem:[%s7441_s1 + $0xac8] ss:$16 sps:$4 sm:$0xff]   ;;  %v5323_v45 = vld [vmem:[%s7441_s1 + $0xae4] ss:$16 sps:$4 sm:$0xff]  }
 0x14b   :  { %3389 = vmatpush1.bf16.msra.mxu0 %v5291_v27  ;;  %3717 = vmatpush1.bf16.msra.mxu1 %v5294_v28  ;;  %v5326_v46 = vld [vmem:[%s7441_s1 + $0xaec] ss:$16 sps:$4 sm:$0xff]   ;;  %v5321_v47 = vld [vmem:[%s7441_s1 + $0xae0] ss:$16 sps:$4 sm:$0xff]   ;;  %v5324_v48 = vld [vmem:[%s7441_s1 + $0xae8] ss:$16 sps:$4 sm:$0xff]  }
 0x14c   :  { %3390 = vmatprep.subr.bf16.mxu0 %v5299_v29  ;;  %3718 = vmatprep.subr.bf16.mxu1 %v5302_v30  ;;  %v5329_v49 = vld [vmem:[%s7441_s1 + $0xb04] ss:$16 sps:$4 sm:$0xff]   ;;  %v5332_v50 = vld [vmem:[%s7441_s1 + $0xb0c] ss:$16 sps:$4 sm:$0xff]   ;;  %v5327_v51 = vld [vmem:[%s7441_s1 + $0xb00] ss:$16 sps:$4 sm:$0xff]  }
 0x14d   :  { %v5330_v52 = vld [vmem:[%s7441_s1 + $0xb08] ss:$16 sps:$4 sm:$0xff]   ;;  %v5335_v53 = vld [vmem:[%s7441_s1 + $0xb24] ss:$16 sps:$4 sm:$0xff]   ;;  %v5338_v54 = vld [vmem:[%s7441_s1 + $0xb2c] ss:$16 sps:$4 sm:$0xff]  }
 0x14e   :  { %v5333_v55 = vld [vmem:[%s7441_s1 + $0xb20] ss:$16 sps:$4 sm:$0xff]   ;;  %v5336_v56 = vld [vmem:[%s7441_s1 + $0xb28] ss:$16 sps:$4 sm:$0xff]   ;;  %v5341_v57 = vld [vmem:[%s7441_s1 + $0xb44] ss:$16 sps:$4 sm:$0xff]  }
 0x14f   :  { %3391 = vmatpush1.bf16.msra.mxu0 %v5297_v31  ;;  %3719 = vmatpush1.bf16.msra.mxu1 %v5300_v32  ;;  %v5344_v58 = vld [vmem:[%s7441_s1 + $0xb4c] ss:$16 sps:$4 sm:$0xff]   ;;  %v5339_v59 = vld [vmem:[%s7441_s1 + $0xb40] ss:$16 sps:$4 sm:$0xff]   ;;  %v5342_v60 = vld [vmem:[%s7441_s1 + $0xb48] ss:$16 sps:$4 sm:$0xff]  }
 0x150   :  { %3392 = vmatprep.subr.bf16.mxu0 %v5305_v33  ;;  %3720 = vmatprep.subr.bf16.mxu1 %v5308_v34  ;;  %v5347_v61 = vld [vmem:[%s7441_s1 + $0xb64] ss:$16 sps:$4 sm:$0xff]   ;;  %v5350_v62 = vld [vmem:[%s7441_s1 + $0xb6c] ss:$16 sps:$4 sm:$0xff]   ;;  %v5345_v63 = vld [vmem:[%s7441_s1 + $0xb60] ss:$16 sps:$4 sm:$0xff]  }
 0x151   :  { %v5348_v0 = vld [vmem:[%s7441_s1 + $0xb68] ss:$16 sps:$4 sm:$0xff]   ;;  %v5353_v1 = vld [vmem:[%s7441_s1 + $0xb84] ss:$16 sps:$4 sm:$0xff]   ;;  %v5356_v2 = vld [vmem:[%s7441_s1 + $0xb8c] ss:$16 sps:$4 sm:$0xff]  }
 0x152   :  { %v5351_v3 = vld [vmem:[%s7441_s1 + $0xb80] ss:$16 sps:$4 sm:$0xff]   ;;  %v5354_v4 = vld [vmem:[%s7441_s1 + $0xb88] ss:$16 sps:$4 sm:$0xff]   ;;  %v5359_v5 = vld [vmem:[%s7441_s1 + $0xba4] ss:$16 sps:$4 sm:$0xff]  }
 0x153   :  { %3393 = vmatpush1.bf16.msra.mxu0 %v5303_v35  ;;  %3721 = vmatpush1.bf16.msra.mxu1 %v5306_v36  ;;  %v5362_v6 = vld [vmem:[%s7441_s1 + $0xbac] ss:$16 sps:$4 sm:$0xff]   ;;  %v5357_v7 = vld [vmem:[%s7441_s1 + $0xba0] ss:$16 sps:$4 sm:$0xff]   ;;  %v5360_v8 = vld [vmem:[%s7441_s1 + $0xba8] ss:$16 sps:$4 sm:$0xff]  }
 0x154   :  { %3394 = vmatprep.subr.bf16.mxu0 %v5311_v37  ;;  %3722 = vmatprep.subr.bf16.mxu1 %v5314_v38  ;;  %v5365_v9 = vld [vmem:[%s7441_s1 + $0xbc4] ss:$16 sps:$4 sm:$0xff]   ;;  %v5368_v10 = vld [vmem:[%s7441_s1 + $0xbcc] ss:$16 sps:$4 sm:$0xff]   ;;  %v5363_v12 = vld [vmem:[%s7441_s1 + $0xbc0] ss:$16 sps:$4 sm:$0xff]  }
 0x155   :  { %v5366_v13 = vld [vmem:[%s7441_s1 + $0xbc8] ss:$16 sps:$4 sm:$0xff]   ;;  %v5371_v15 = vld [vmem:[%s7441_s1 + $0xbe4] ss:$16 sps:$4 sm:$0xff]   ;;  %v5374_v11 = vld [vmem:[%s7441_s1 + $0xbec] ss:$16 sps:$4 sm:$0xff]  }
 0x156   :  { %v5369_v17 = vld [vmem:[%s7441_s1 + $0xbe0] ss:$16 sps:$4 sm:$0xff]   ;;  %v5372_v14 = vld [vmem:[%s7441_s1 + $0xbe8] ss:$16 sps:$4 sm:$0xff]   ;;  %v5379_v19 = vld [vmem:[%s7441_s1 + $0xc04] ss:$16 sps:$4 sm:$0xff]  }
 0x157   :  { %3395 = vmatpush1.bf16.msra.mxu0 %v5309_v39  ;;  %3723 = vmatpush1.bf16.msra.mxu1 %v5312_v40  ;;  %v5382_v20 = vld [vmem:[%s7441_s1 + $0xc0c] ss:$16 sps:$4 sm:$0xff]   ;;  %v6837_v16 = vld [vmem:[%s7440_s0 + $0x30] sm:$0xff]  ;;  %v5380_v23 = vld [vmem:[%s7441_s1 + $0xc08] ss:$16 sps:$4 sm:$0xff]   ;;  %s5597_s23 = smov [#allocation2]  }
 0x158   :  { %3396 = vmatprep.subr.bf16.mxu0 %v5317_v41  ;;  %3724 = vmatprep.subr.bf16.mxu1 %v5320_v42  ;;  %v5377_v22 = vld [vmem:[%s7441_s1 + $0xc00] ss:$16 sps:$4 sm:$0xff]   ;;  %v5385_v18 = vld [vmem:[%s7441_s1 + $0xc24] ss:$16 sps:$4 sm:$0xff]   ;;  %v5388_v24 = vld [vmem:[%s7441_s1 + $0xc2c] ss:$16 sps:$4 sm:$0xff]   ;;  %v4078_v25 = vcombine.high %v6837_v16, %v6837_v16 }
 0x159   :  { %v5383_v26 = vld [vmem:[%s7441_s1 + $0xc20] ss:$16 sps:$4 sm:$0xff]   ;;  %v5386_v27 = vld [vmem:[%s7441_s1 + $0xc28] ss:$16 sps:$4 sm:$0xff]   ;;  %v5391_v28 = vld [vmem:[%s7441_s1 + $0xc44] ss:$16 sps:$4 sm:$0xff]  }
 0x15a   :  { %v5394_v29 = vld [vmem:[%s7441_s1 + $0xc4c] ss:$16 sps:$4 sm:$0xff]   ;;  %v5389_v30 = vld [vmem:[%s7441_s1 + $0xc40] ss:$16 sps:$4 sm:$0xff]   ;;  %v5392_v31 = vld [vmem:[%s7441_s1 + $0xc48] ss:$16 sps:$4 sm:$0xff]  }
 0x15b   :  { %3397 = vmatpush1.bf16.msra.mxu0 %v5315_v43  ;;  %3725 = vmatpush1.bf16.msra.mxu1 %v5318_v44  ;;  %v5397_v32 = vld [vmem:[%s7441_s1 + $0xc64] ss:$16 sps:$4 sm:$0xff]   ;;  %v5400_v33 = vld [vmem:[%s7441_s1 + $0xc6c] ss:$16 sps:$4 sm:$0xff]   ;;  %v5395_v34 = vld [vmem:[%s7441_s1 + $0xc60] ss:$16 sps:$4 sm:$0xff]  }
 0x15c   :  { %3398 = vmatprep.subr.bf16.mxu0 %v5323_v45  ;;  %3726 = vmatprep.subr.bf16.mxu1 %v5326_v46  ;;  %v5398_v35 = vld [vmem:[%s7441_s1 + $0xc68] ss:$16 sps:$4 sm:$0xff]   ;;  %v5403_v36 = vld [vmem:[%s7441_s1 + $0xc84] ss:$16 sps:$4 sm:$0xff]   ;;  %v5406_v37 = vld [vmem:[%s7441_s1 + $0xc8c] ss:$16 sps:$4 sm:$0xff]  }
 0x15d   :  { %v5401_v38 = vld [vmem:[%s7441_s1 + $0xc80] ss:$16 sps:$4 sm:$0xff]   ;;  %v5404_v39 = vld [vmem:[%s7441_s1 + $0xc88] ss:$16 sps:$4 sm:$0xff]   ;;  %v5409_v40 = vld [vmem:[%s7441_s1 + $0xca4] ss:$16 sps:$4 sm:$0xff]  }
 0x15e   :  { %v5412_v41 = vld [vmem:[%s7441_s1 + $0xcac] ss:$16 sps:$4 sm:$0xff]   ;;  %v5407_v42 = vld [vmem:[%s7441_s1 + $0xca0] ss:$16 sps:$4 sm:$0xff]   ;;  %v5410_v43 = vld [vmem:[%s7441_s1 + $0xca8] ss:$16 sps:$4 sm:$0xff]  }
 0x15f   :  { %3399 = vmatpush1.bf16.msra.mxu0 %v5321_v47  ;;  %3727 = vmatpush1.bf16.msra.mxu1 %v5324_v48  ;;  %v5415_v44 = vld [vmem:[%s7441_s1 + $0xcc4] ss:$16 sps:$4 sm:$0xff]   ;;  %v5418_v45 = vld [vmem:[%s7441_s1 + $0xccc] ss:$16 sps:$4 sm:$0xff]   ;;  %v5413_v46 = vld [vmem:[%s7441_s1 + $0xcc0] ss:$16 sps:$4 sm:$0xff]  }
 0x160   :  { %3400 = vmatprep.subr.bf16.mxu0 %v5329_v49  ;;  %3728 = vmatprep.subr.bf16.mxu1 %v5332_v50  ;;  %v5416_v47 = vld [vmem:[%s7441_s1 + $0xcc8] ss:$16 sps:$4 sm:$0xff]   ;;  %v5421_v48 = vld [vmem:[%s7441_s1 + $0xce4] ss:$16 sps:$4 sm:$0xff]   ;;  %v5424_v49 = vld [vmem:[%s7441_s1 + $0xcec] ss:$16 sps:$4 sm:$0xff]  }
 0x161   :  { %v5419_v50 = vld [vmem:[%s7441_s1 + $0xce0] ss:$16 sps:$4 sm:$0xff]   ;;  %s4057_s24 = sshll.u32 %s5597_s23, 4  ;;  %s4058_s24 = int_to_ptr.vmem [resolvable:$true] %s4057_s24 }
 0x162   :  { %s5573_s25 = scalar_lea.vmem %s4058_s24, 128  ;;  %p5578_p1 = scmp.lt.s32.totalorder %s4058_s24, %s4058_s24 }
 0x163   :  { %3401 = vmatpush1.bf16.msra.mxu0 %v5327_v51  ;;  %3729 = vmatpush1.bf16.msra.mxu1 %v5330_v52  ;;  %v5422_v51 = vld [vmem:[%s7441_s1 + $0xce8] ss:$16 sps:$4 sm:$0xff]   ;;  %v5427_v52 = vld [vmem:[%s7441_s1 + $0xd04] ss:$16 sps:$4 sm:$0xff]   ;;  %p5574_p0 = scmp.ne.s32.totalorder %s4058_s24, %s5573_s25  ;;  %p5579_p2 = scmp.lt.s32.totalorder %s5573_s25, %s5573_s25 }
 0x164   :  { %3402 = vmatprep.subr.bf16.mxu0 %v5335_v53  ;;  %3730 = vmatprep.subr.bf16.mxu1 %v5338_v54  ;;  %v5430_v53 = vld [vmem:[%s7441_s1 + $0xd0c] ss:$16 sps:$4 sm:$0xff]   ;;  %v5425_v54 = vld [vmem:[%s7441_s1 + $0xd00] ss:$16 sps:$4 sm:$0xff]  }
 0x165   :  { %p5580_p3 = por %p5579_p2, %p5578_p1 }
 0x167   :  { %3403 = vmatpush1.bf16.msra.mxu0 %v5333_v55  ;;  %3731 = vmatpush1.bf16.msra.mxu1 %v5336_v56  ;;  %v5428_v55 = vld [vmem:[%s7441_s1 + $0xd08] ss:$16 sps:$4 sm:$0xff]   ;;  %v5433_v56 = vld [vmem:[%s7441_s1 + $0xd24] ss:$16 sps:$4 sm:$0xff]   ;;  %p5581_p4 = pnand %p5580_p3, %p5574_p0 }
 0x168   :  { %3404 = vmatprep.subr.bf16.mxu0 %v5341_v57  ;;  %3732 = vmatprep.subr.bf16.mxu1 %v5344_v58  ;;  %v5436_v57 = vld [vmem:[%s7441_s1 + $0xd2c] ss:$16 sps:$4 sm:$0xff]   ;;  %v5431_v58 = vld [vmem:[%s7441_s1 + $0xd20] ss:$16 sps:$4 sm:$0xff]  }
 0x16b   :  { %3405 = vmatpush1.bf16.msra.mxu0 %v5339_v59  ;;  %3733 = vmatpush1.bf16.msra.mxu1 %v5342_v60  ;;  %v5434_v59 = vld [vmem:[%s7441_s1 + $0xd28] ss:$16 sps:$4 sm:$0xff]   ;;  %v5439_v60 = vld [vmem:[%s7441_s1 + $0xd44] ss:$16 sps:$4 sm:$0xff]  }
 0x16c   :  { %3406 = vmatprep.subr.bf16.mxu0 %v5347_v61  ;;  %3734 = vmatprep.subr.bf16.mxu1 %v5350_v62  ;;  %v5442_v61 = vld [vmem:[%s7441_s1 + $0xd4c] ss:$16 sps:$4 sm:$0xff]   ;;  %v5437_v62 = vld [vmem:[%s7441_s1 + $0xd40] ss:$16 sps:$4 sm:$0xff]  }
 0x16f   :  { %3407 = vmatpush1.bf16.msra.mxu0 %v5345_v63  ;;  %3735 = vmatpush1.bf16.msra.mxu1 %v5348_v0  ;;  %v5440_v63 = vld [vmem:[%s7441_s1 + $0xd48] ss:$16 sps:$4 sm:$0xff]   ;;  %v5445_v0 = vld [vmem:[%s7441_s1 + $0xd64] ss:$16 sps:$4 sm:$0xff]  }
 0x170   :  { %3408 = vmatprep.subr.bf16.mxu0 %v5353_v1  ;;  %3736 = vmatprep.subr.bf16.mxu1 %v5356_v2  ;;  %v5448_v1 = vld [vmem:[%s7441_s1 + $0xd6c] ss:$16 sps:$4 sm:$0xff]   ;;  %v5443_v2 = vld [vmem:[%s7441_s1 + $0xd60] ss:$16 sps:$4 sm:$0xff]  }
 0x173   :  { %3409 = vmatpush1.bf16.msra.mxu0 %v5351_v3  ;;  %3737 = vmatpush1.bf16.msra.mxu1 %v5354_v4  ;;  %v5446_v3 = vld [vmem:[%s7441_s1 + $0xd68] ss:$16 sps:$4 sm:$0xff]   ;;  %v5451_v4 = vld [vmem:[%s7441_s1 + $0xd84] ss:$16 sps:$4 sm:$0xff]  }
 0x174   :  { %3410 = vmatprep.subr.bf16.mxu0 %v5359_v5  ;;  %3738 = vmatprep.subr.bf16.mxu1 %v5362_v6  ;;  %v5454_v5 = vld [vmem:[%s7441_s1 + $0xd8c] ss:$16 sps:$4 sm:$0xff]   ;;  %v5449_v6 = vld [vmem:[%s7441_s1 + $0xd80] ss:$16 sps:$4 sm:$0xff]  }
 0x177   :  { %3411 = vmatpush1.bf16.msra.mxu0 %v5357_v7  ;;  %3739 = vmatpush1.bf16.msra.mxu1 %v5360_v8  ;;  %v5452_v7 = vld [vmem:[%s7441_s1 + $0xd88] ss:$16 sps:$4 sm:$0xff]   ;;  %v5457_v8 = vld [vmem:[%s7441_s1 + $0xda4] ss:$16 sps:$4 sm:$0xff]  }
 0x178   :  { %3412 = vmatprep.subr.bf16.mxu0 %v5365_v9  ;;  %3740 = vmatprep.subr.bf16.mxu1 %v5368_v10  ;;  %v5460_v9 = vld [vmem:[%s7441_s1 + $0xdac] ss:$16 sps:$4 sm:$0xff]   ;;  %v5455_v10 = vld [vmem:[%s7441_s1 + $0xda0] ss:$16 sps:$4 sm:$0xff]  }
 0x17b   :  { %3413 = vmatpush1.bf16.msra.mxu0 %v5363_v12  ;;  %3741 = vmatpush1.bf16.msra.mxu1 %v5366_v13  ;;  %v5458_v12 = vld [vmem:[%s7441_s1 + $0xda8] ss:$16 sps:$4 sm:$0xff]   ;;  %v5463_v13 = vld [vmem:[%s7441_s1 + $0xdc4] ss:$16 sps:$4 sm:$0xff]  }
 0x17c   :  { %3414 = vmatprep.subr.bf16.mxu0 %v5371_v15  ;;  %3742 = vmatprep.subr.bf16.mxu1 %v5374_v11  ;;  %v5466_v15 = vld [vmem:[%s7441_s1 + $0xdcc] ss:$16 sps:$4 sm:$0xff]   ;;  %v5461_v11 = vld [vmem:[%s7441_s1 + $0xdc0] ss:$16 sps:$4 sm:$0xff]  }
 0x17f   :  { %3415 = vmatpush1.bf16.msra.mxu0 %v5369_v17  ;;  %3743 = vmatpush1.bf16.msra.mxu1 %v5372_v14  ;;  %v5464_v17 = vld [vmem:[%s7441_s1 + $0xdc8] ss:$16 sps:$4 sm:$0xff]   ;;  %v5469_v14 = vld [vmem:[%s7441_s1 + $0xde4] ss:$16 sps:$4 sm:$0xff]  }
 0x180   :  { %3425 = vmatprep.subr.bf16.mxu0 %v5379_v19  ;;  %3753 = vmatprep.subr.bf16.mxu1 %v5382_v20  ;;  %v5472_v19 = vld [vmem:[%s7441_s1 + $0xdec] ss:$16 sps:$4 sm:$0xff]   ;;  %v5467_v20 = vld [vmem:[%s7441_s1 + $0xde0] ss:$16 sps:$4 sm:$0xff]  }
 0x182   :  { %3417 = vmatmul.mubr.bf16.vlgmr.msra.gmra.mrb[0].mxu0 %v4075_v21  ;;  %3745 = vmatmul.mubr.bf16.vlgmr.msra.gmra.mrb[0].mxu1 %v4075_v21  ;;  %v5470_v21 = vld [vmem:[%s7441_s1 + $0xde8] ss:$16 sps:$4 sm:$0xff]  }
 0x183   :  { %3426 = vmatpush1.bf16.msra.mxu0 %v5377_v22  ;;  %3754 = vmatpush1.bf16.msra.mxu1 %v5380_v23  ;;  %v5477_v22 = vld [vmem:[%s7441_s1 + $0xe04] ss:$16 sps:$4 sm:$0xff]   ;;  %v5480_v23 = vld [vmem:[%s7441_s1 + $0xe0c] ss:$16 sps:$4 sm:$0xff]  }
 0x184   :  { %3427 = vmatprep.subr.bf16.mxu0 %v5385_v18  ;;  %3755 = vmatprep.subr.bf16.mxu1 %v5388_v24  ;;  %v4077_v18 = vcombine.low %v6837_v16, %v6837_v16  ;;  %v7038_v24 = vld [vmem:[%s7440_s0 + $0x38] sm:$0xff]  ;;  %v5483_v16 = vld [vmem:[%s7441_s1 + $0xe24] ss:$16 sps:$4 sm:$0xff]  }
 0x185   :  { %3457 = vmatprep.mubr.bf16.mxu0 %v4078_v25  ;;  %3785 = vmatprep.mubr.bf16.mxu1 %v4078_v25  ;;  %v5475_v25 = vld [vmem:[%s7441_s1 + $0xe00] ss:$16 sps:$4 sm:$0xff]  }
 0x187   :  { %3428 = vmatpush1.bf16.msra.mxu0 %v5383_v26  ;;  %3756 = vmatpush1.bf16.msra.mxu1 %v5386_v27  ;;  %v5478_v26 = vld [vmem:[%s7441_s1 + $0xe08] ss:$16 sps:$4 sm:$0xff]   ;;  %v5486_v27 = vld [vmem:[%s7441_s1 + $0xe2c] ss:$16 sps:$4 sm:$0xff]  }
 0x188   :  { %3429 = vmatprep.subr.bf16.mxu0 %v5391_v28  ;;  %3757 = vmatprep.subr.bf16.mxu1 %v5394_v29  ;;  %v4080_v28 = vcombine.high %v7038_v24, %v7038_v24  ;;  %v5481_v29 = vld [vmem:[%s7441_s1 + $0xe20] ss:$16 sps:$4 sm:$0xff]  }
 0x18b   :  { %3430 = vmatpush1.bf16.msra.mxu0 %v5389_v30  ;;  %3758 = vmatpush1.bf16.msra.mxu1 %v5392_v31  ;;  %v5484_v30 = vld [vmem:[%s7441_s1 + $0xe28] ss:$16 sps:$4 sm:$0xff]   ;;  %v5489_v31 = vld [vmem:[%s7441_s1 + $0xe44] ss:$16 sps:$4 sm:$0xff]  }
 0x18c   :  { %3431 = vmatprep.subr.bf16.mxu0 %v5397_v32  ;;  %3759 = vmatprep.subr.bf16.mxu1 %v5400_v33  ;;  %v5492_v32 = vld [vmem:[%s7441_s1 + $0xe4c] ss:$16 sps:$4 sm:$0xff]   ;;  %v5487_v33 = vld [vmem:[%s7441_s1 + $0xe40] ss:$16 sps:$4 sm:$0xff]  }
 0x18f   :  { %3432 = vmatpush1.bf16.msra.mxu0 %v5395_v34  ;;  %3760 = vmatpush1.bf16.msra.mxu1 %v5398_v35  ;;  %v5490_v34 = vld [vmem:[%s7441_s1 + $0xe48] ss:$16 sps:$4 sm:$0xff]   ;;  %v5495_v35 = vld [vmem:[%s7441_s1 + $0xe64] ss:$16 sps:$4 sm:$0xff]  }
 0x190   :  { %3433 = vmatprep.subr.bf16.mxu0 %v5403_v36  ;;  %3761 = vmatprep.subr.bf16.mxu1 %v5406_v37  ;;  %v5498_v36 = vld [vmem:[%s7441_s1 + $0xe6c] ss:$16 sps:$4 sm:$0xff]   ;;  %v5493_v37 = vld [vmem:[%s7441_s1 + $0xe60] ss:$16 sps:$4 sm:$0xff]  }
 0x193   :  { %3434 = vmatpush1.bf16.msra.mxu0 %v5401_v38  ;;  %3762 = vmatpush1.bf16.msra.mxu1 %v5404_v39  ;;  %v5496_v38 = vld [vmem:[%s7441_s1 + $0xe68] ss:$16 sps:$4 sm:$0xff]   ;;  %v5501_v39 = vld [vmem:[%s7441_s1 + $0xe84] ss:$16 sps:$4 sm:$0xff]  }
 0x194   :  { %3435 = vmatprep.subr.bf16.mxu0 %v5409_v40  ;;  %3763 = vmatprep.subr.bf16.mxu1 %v5412_v41  ;;  %v5504_v40 = vld [vmem:[%s7441_s1 + $0xe8c] ss:$16 sps:$4 sm:$0xff]   ;;  %v5499_v41 = vld [vmem:[%s7441_s1 + $0xe80] ss:$16 sps:$4 sm:$0xff]  }
 0x197   :  { %3436 = vmatpush1.bf16.msra.mxu0 %v5407_v42  ;;  %3764 = vmatpush1.bf16.msra.mxu1 %v5410_v43  ;;  %v5502_v42 = vld [vmem:[%s7441_s1 + $0xe88] ss:$16 sps:$4 sm:$0xff]   ;;  %v5507_v43 = vld [vmem:[%s7441_s1 + $0xea4] ss:$16 sps:$4 sm:$0xff]  }
 0x198   :  { %3437 = vmatprep.subr.bf16.mxu0 %v5415_v44  ;;  %3765 = vmatprep.subr.bf16.mxu1 %v5418_v45  ;;  %v5510_v44 = vld [vmem:[%s7441_s1 + $0xeac] ss:$16 sps:$4 sm:$0xff]   ;;  %v5505_v45 = vld [vmem:[%s7441_s1 + $0xea0] ss:$16 sps:$4 sm:$0xff]  }
 0x19b   :  { %3438 = vmatpush1.bf16.msra.mxu0 %v5413_v46  ;;  %3766 = vmatpush1.bf16.msra.mxu1 %v5416_v47  ;;  %v5508_v46 = vld [vmem:[%s7441_s1 + $0xea8] ss:$16 sps:$4 sm:$0xff]   ;;  %v5513_v47 = vld [vmem:[%s7441_s1 + $0xec4] ss:$16 sps:$4 sm:$0xff]  }
 0x19c   :  { %3439 = vmatprep.subr.bf16.mxu0 %v5421_v48  ;;  %3767 = vmatprep.subr.bf16.mxu1 %v5424_v49  ;;  %v5516_v48 = vld [vmem:[%s7441_s1 + $0xecc] ss:$16 sps:$4 sm:$0xff]   ;;  %v5511_v49 = vld [vmem:[%s7441_s1 + $0xec0] ss:$16 sps:$4 sm:$0xff]  }
 0x19f   :  { %3440 = vmatpush1.bf16.msra.mxu0 %v5419_v50  ;;  %3768 = vmatpush1.bf16.msra.mxu1 %v5422_v51  ;;  %v5514_v50 = vld [vmem:[%s7441_s1 + $0xec8] ss:$16 sps:$4 sm:$0xff]   ;;  %v5519_v51 = vld [vmem:[%s7441_s1 + $0xee4] ss:$16 sps:$4 sm:$0xff]  }
 0x1a0   :  { %3441 = vmatprep.subr.bf16.mxu0 %v5427_v52  ;;  %3769 = vmatprep.subr.bf16.mxu1 %v5430_v53  ;;  %v5522_v52 = vld [vmem:[%s7441_s1 + $0xeec] ss:$16 sps:$4 sm:$0xff]   ;;  %v5517_v53 = vld [vmem:[%s7441_s1 + $0xee0] ss:$16 sps:$4 sm:$0xff]  }
 0x1a3   :  { %3442 = vmatpush1.bf16.msra.mxu0 %v5425_v54  ;;  %3770 = vmatpush1.bf16.msra.mxu1 %v5428_v55  ;;  %v5520_v54 = vld [vmem:[%s7441_s1 + $0xee8] ss:$16 sps:$4 sm:$0xff]   ;;  %v5525_v55 = vld [vmem:[%s7441_s1 + $0xf04] ss:$16 sps:$4 sm:$0xff]  }
 0x1a4   :  { %3443 = vmatprep.subr.bf16.mxu0 %v5433_v56  ;;  %3771 = vmatprep.subr.bf16.mxu1 %v5436_v57  ;;  %v5528_v56 = vld [vmem:[%s7441_s1 + $0xf0c] ss:$16 sps:$4 sm:$0xff]   ;;  %v5523_v57 = vld [vmem:[%s7441_s1 + $0xf00] ss:$16 sps:$4 sm:$0xff]  }
 0x1a7   :  { %3444 = vmatpush1.bf16.msra.mxu0 %v5431_v58  ;;  %3772 = vmatpush1.bf16.msra.mxu1 %v5434_v59  ;;  %v5526_v58 = vld [vmem:[%s7441_s1 + $0xf08] ss:$16 sps:$4 sm:$0xff]   ;;  %v5531_v59 = vld [vmem:[%s7441_s1 + $0xf24] ss:$16 sps:$4 sm:$0xff]  }
 0x1a8   :  { %3445 = vmatprep.subr.bf16.mxu0 %v5439_v60  ;;  %3773 = vmatprep.subr.bf16.mxu1 %v5442_v61  ;;  %v5534_v60 = vld [vmem:[%s7441_s1 + $0xf2c] ss:$16 sps:$4 sm:$0xff]   ;;  %v5529_v61 = vld [vmem:[%s7441_s1 + $0xf20] ss:$16 sps:$4 sm:$0xff]  }
 0x1ab   :  { %3446 = vmatpush1.bf16.msra.mxu0 %v5437_v62  ;;  %3774 = vmatpush1.bf16.msra.mxu1 %v5440_v63  ;;  %v5532_v62 = vld [vmem:[%s7441_s1 + $0xf28] ss:$16 sps:$4 sm:$0xff]   ;;  %v5537_v63 = vld [vmem:[%s7441_s1 + $0xf44] ss:$16 sps:$4 sm:$0xff]  }
 0x1ac   :  { %3447 = vmatprep.subr.bf16.mxu0 %v5445_v0  ;;  %3775 = vmatprep.subr.bf16.mxu1 %v5448_v1  ;;  %v5540_v0 = vld [vmem:[%s7441_s1 + $0xf4c] ss:$16 sps:$4 sm:$0xff]   ;;  %v5535_v1 = vld [vmem:[%s7441_s1 + $0xf40] ss:$16 sps:$4 sm:$0xff]  }
 0x1af   :  { %3448 = vmatpush1.bf16.msra.mxu0 %v5443_v2  ;;  %3776 = vmatpush1.bf16.msra.mxu1 %v5446_v3  ;;  %v5538_v2 = vld [vmem:[%s7441_s1 + $0xf48] ss:$16 sps:$4 sm:$0xff]   ;;  %v5543_v3 = vld [vmem:[%s7441_s1 + $0xf64] ss:$16 sps:$4 sm:$0xff]  }
 0x1b0   :  { %3449 = vmatprep.subr.bf16.mxu0 %v5451_v4  ;;  %3777 = vmatprep.subr.bf16.mxu1 %v5454_v5  ;;  %v5546_v4 = vld [vmem:[%s7441_s1 + $0xf6c] ss:$16 sps:$4 sm:$0xff]   ;;  %v5541_v5 = vld [vmem:[%s7441_s1 + $0xf60] ss:$16 sps:$4 sm:$0xff]  }
 0x1b3   :  { %3450 = vmatpush1.bf16.msra.mxu0 %v5449_v6  ;;  %3778 = vmatpush1.bf16.msra.mxu1 %v5452_v7  ;;  %v5544_v6 = vld [vmem:[%s7441_s1 + $0xf68] ss:$16 sps:$4 sm:$0xff]   ;;  %v5549_v7 = vld [vmem:[%s7441_s1 + $0xf84] ss:$16 sps:$4 sm:$0xff]  }
 0x1b4   :  { %3451 = vmatprep.subr.bf16.mxu0 %v5457_v8  ;;  %3779 = vmatprep.subr.bf16.mxu1 %v5460_v9  ;;  %v5552_v8 = vld [vmem:[%s7441_s1 + $0xf8c] ss:$16 sps:$4 sm:$0xff]   ;;  %v5547_v9 = vld [vmem:[%s7441_s1 + $0xf80] ss:$16 sps:$4 sm:$0xff]  }
 0x1b7   :  { %3452 = vmatpush1.bf16.msra.mxu0 %v5455_v10  ;;  %3780 = vmatpush1.bf16.msra.mxu1 %v5458_v12  ;;  %v5550_v10 = vld [vmem:[%s7441_s1 + $0xf88] ss:$16 sps:$4 sm:$0xff]   ;;  %v5555_v12 = vld [vmem:[%s7441_s1 + $0xfa4] ss:$16 sps:$4 sm:$0xff]  }
 0x1b8   :  { %3453 = vmatprep.subr.bf16.mxu0 %v5463_v13  ;;  %3781 = vmatprep.subr.bf16.mxu1 %v5466_v15  ;;  %v5558_v13 = vld [vmem:[%s7441_s1 + $0xfac] ss:$16 sps:$4 sm:$0xff]   ;;  %v5553_v15 = vld [vmem:[%s7441_s1 + $0xfa0] ss:$16 sps:$4 sm:$0xff]  }
 0x1bb   :  { %3454 = vmatpush1.bf16.msra.mxu0 %v5461_v11  ;;  %3782 = vmatpush1.bf16.msra.mxu1 %v5464_v17  ;;  %v5556_v11 = vld [vmem:[%s7441_s1 + $0xfa8] ss:$16 sps:$4 sm:$0xff]   ;;  %v5561_v17 = vld [vmem:[%s7441_s1 + $0xfc4] ss:$16 sps:$4 sm:$0xff]  }
 0x1bc   :  { %3455 = vmatprep.subr.bf16.mxu0 %v5469_v14  ;;  %3783 = vmatprep.subr.bf16.mxu1 %v5472_v19  ;;  %v5564_v14 = vld [vmem:[%s7441_s1 + $0xfcc] ss:$16 sps:$4 sm:$0xff]   ;;  %v5559_v19 = vld [vmem:[%s7441_s1 + $0xfc0] ss:$16 sps:$4 sm:$0xff]  }
 0x1bf   :  { %3456 = vmatpush1.bf16.msra.mxu0 %v5467_v20  ;;  %3784 = vmatpush1.bf16.msra.mxu1 %v5470_v21  ;;  %v5562_v20 = vld [vmem:[%s7441_s1 + $0xfc8] ss:$16 sps:$4 sm:$0xff]   ;;  %v5567_v21 = vld [vmem:[%s7441_s1 + $0xfe4] ss:$16 sps:$4 sm:$0xff]  }
 0x1c0   :  { %3466 = vmatprep.subr.bf16.mxu0 %v5477_v22  ;;  %3794 = vmatprep.subr.bf16.mxu1 %v5480_v23  ;;  %v5570_v22 = vld [vmem:[%s7441_s1 + $0xfec] ss:$16 sps:$4 sm:$0xff]   ;;  %v3855_v23 = vld [vmem:[%s7443_s3 + $0x80] sm:$0xff] }
 0x1c2   :  { %3458 = vmatmul.mubr.bf16.vlgmr.msra.gmra.mrb[0].mxu0 %v4077_v18  ;;  %3786 = vmatmul.mubr.bf16.vlgmr.msra.gmra.mrb[0].mxu1 %v4077_v18  ;;  %v3856_v18 = vld [vmem:[%s7443_s3 + $0x88] sm:$0xff] }
 0x1c3   :  { %3467 = vmatpush1.bf16.msra.mxu0 %v5475_v25  ;;  %3795 = vmatpush1.bf16.msra.mxu1 %v5478_v26  ;;  %v3887_v25 = vld [vmem:[%s7443_s3 + $0x180] sm:$0xff]  ;;  %v3888_v26 = vld [vmem:[%s7443_s3 + $0x188] sm:$0xff] }
 0x1c4   :  { %3468 = vmatprep.subr.bf16.mxu0 %v5483_v16  ;;  %3796 = vmatprep.subr.bf16.mxu1 %v5486_v27  ;;  %v5565_v16 = vld [vmem:[%s7441_s1 + $0xfe0] ss:$16 sps:$4 sm:$0xff]   ;;  %v5568_v27 = vld [vmem:[%s7441_s1 + $0xfe8] ss:$16 sps:$4 sm:$0xff]  }
 0x1c5   :  { %3498 = vmatprep.mubr.bf16.mxu0 %v4080_v28  ;;  %3826 = vmatprep.mubr.bf16.mxu1 %v4080_v28  ;;  %v3839_v28 = vld [vmem:[%s7443_s3] sm:$0xff] }
 0x1c7   :  { %3469 = vmatpush1.bf16.msra.mxu0 %v5481_v29  ;;  %3797 = vmatpush1.bf16.msra.mxu1 %v5484_v30  ;;  %v3840_v29 = vld [vmem:[%s7443_s3 + $0x8] sm:$0xff]  ;;  %v4664_v30 = vpack.c.bf16 %v3856_v18, %v3855_v23  ;;  %v3898_v23 = vld [vmem:[%s7443_s3 + $0x1d8] sm:$0xff] }
 0x1c8   :  { %3470 = vmatprep.subr.bf16.mxu0 %v5489_v31  ;;  %3798 = vmatprep.subr.bf16.mxu1 %v5492_v32  ;;  %v4696_v31 = vpack.c.bf16 %v3888_v26, %v3887_v25  ;;  %v3871_v32 = vld [vmem:[%s7443_s3 + $0x100] sm:$0xff]  ;;  %v3849_v26 = vld [vmem:[%s7443_s3 + $0x50] sm:$0xff] }
 0x1cb   :  { %3471 = vmatpush1.bf16.msra.mxu0 %v5487_v33  ;;  %3799 = vmatpush1.bf16.msra.mxu1 %v5490_v34  ;;  %v3872_v33 = vld [vmem:[%s7443_s3 + $0x108] sm:$0xff]  ;;  %v3857_v34 = vld [vmem:[%s7443_s3 + $0x90] sm:$0xff] }
 0x1cc   :  { %3472 = vmatprep.subr.bf16.mxu0 %v5495_v35  ;;  %3800 = vmatprep.subr.bf16.mxu1 %v5498_v36  ;;  %v3858_v35 = vld [vmem:[%s7443_s3 + $0x98] sm:$0xff]  ;;  %v3889_v36 = vld [vmem:[%s7443_s3 + $0x190] sm:$0xff] }
 0x1cf   :  { %3473 = vmatpush1.bf16.msra.mxu0 %v5493_v37  ;;  %3801 = vmatpush1.bf16.msra.mxu1 %v5496_v38  ;;  %v3890_v37 = vld [vmem:[%s7443_s3 + $0x198] sm:$0xff]  ;;  %v4079_v38 = vcombine.low %v7038_v24, %v7038_v24  ;;  %v3873_v24 = vld [vmem:[%s7443_s3 + $0x110] sm:$0xff] }
 0x1d0   :  { %3474 = vmatprep.subr.bf16.mxu0 %v5501_v39  ;;  %3802 = vmatprep.subr.bf16.mxu1 %v5504_v40  ;;  %v4666_v39 = vpack.c.bf16 %v3840_v29, %v3839_v28  ;;  %v4698_v40 = vpack.c.bf16 %v3872_v33, %v3871_v32  ;;  %v3881_v29 = vld [vmem:[%s7443_s3 + $0x150] sm:$0xff]  ;;  %v3868_v32 = vld [vmem:[%s7443_s3 + $0xe8] sm:$0xff]  ;;  %v3899_v33 = vld [vmem:[%s7443_s3 + $0x1e0] sm:$0xff] }
 0x1d3   :  { %3475 = vmatpush1.bf16.msra.mxu0 %v5499_v41  ;;  %3803 = vmatpush1.bf16.msra.mxu1 %v5502_v42  ;;  %v3841_v41 = vld [vmem:[%s7443_s3 + $0x10] sm:$0xff]  ;;  %v3842_v42 = vld [vmem:[%s7443_s3 + $0x18] sm:$0xff] }
 0x1d4   :  { %3476 = vmatprep.subr.bf16.mxu0 %v5507_v43  ;;  %3804 = vmatprep.subr.bf16.mxu1 %v5510_v44  ;;  %v4668_v43 = vpack.c.bf16 %v3858_v35, %v3857_v34  ;;  %v4700_v44 = vpack.c.bf16 %v3890_v37, %v3889_v36  ;;  %v3900_v34 = vld [vmem:[%s7443_s3 + $0x1e8] sm:$0xff] }
 0x1d7   :  { %3477 = vmatpush1.bf16.msra.mxu0 %v5505_v45  ;;  %3805 = vmatpush1.bf16.msra.mxu1 %v5508_v46  ;;  %v3874_v45 = vld [vmem:[%s7443_s3 + $0x118] sm:$0xff]  ;;  %v3859_v46 = vld [vmem:[%s7443_s3 + $0xa0] sm:$0xff] }
 0x1d8   :  { %3478 = vmatprep.subr.bf16.mxu0 %v5513_v47  ;;  %3806 = vmatprep.subr.bf16.mxu1 %v5516_v48  ;;  %v3860_v47 = vld [vmem:[%s7443_s3 + $0xa8] sm:$0xff]  ;;  %v3891_v48 = vld [vmem:[%s7443_s3 + $0x1a0] sm:$0xff] }
 0x1db   :  { %3479 = vmatpush1.bf16.msra.mxu0 %v5511_v49  ;;  %3807 = vmatpush1.bf16.msra.mxu1 %v5514_v50  ;;  %v3892_v49 = vld [vmem:[%s7443_s3 + $0x1a8] sm:$0xff]  ;;  %v4670_v50 = vpack.c.bf16 %v3842_v42, %v3841_v41  ;;  %v3883_v41 = vld [vmem:[%s7443_s3 + $0x160] sm:$0xff] }
 0x1dc   :  { %3480 = vmatprep.subr.bf16.mxu0 %v5519_v51  ;;  %3808 = vmatprep.subr.bf16.mxu1 %v5522_v52  ;;  %v4702_v51 = vpack.c.bf16 %v3874_v45, %v3873_v24  ;;  %v3843_v52 = vld [vmem:[%s7443_s3 + $0x20] sm:$0xff]  ;;  %v3869_v24 = vld [vmem:[%s7443_s3 + $0xf0] sm:$0xff]  ;;  %v3870_v45 = vld [vmem:[%s7443_s3 + $0xf8] sm:$0xff] }
 0x1df   :  { %3481 = vmatpush1.bf16.msra.mxu0 %v5517_v53  ;;  %3809 = vmatpush1.bf16.msra.mxu1 %v5520_v54  ;;  %v3844_v53 = vld [vmem:[%s7443_s3 + $0x28] sm:$0xff]  ;;  %v4672_v54 = vpack.c.bf16 %v3860_v47, %v3859_v46  ;;  %v3901_v46 = vld [vmem:[%s7443_s3 + $0x1f0] sm:$0xff]  ;;  %v4692_v47 = vpack.c.bf16 %v3870_v45, %v3869_v24 }
 0x1e0   :  { %3482 = vmatprep.subr.bf16.mxu0 %v5525_v55  ;;  %3810 = vmatprep.subr.bf16.mxu1 %v5528_v56  ;;  %v4704_v55 = vpack.c.bf16 %v3892_v49, %v3891_v48  ;;  %v3875_v56 = vld [vmem:[%s7443_s3 + $0x120] sm:$0xff]  ;;  %v3902_v48 = vld [vmem:[%s7443_s3 + $0x1f8] sm:$0xff]  ;;  %v3853_v49 = vld [vmem:[%s7443_s3 + $0x70] sm:$0xff] }
 0x1e3   :  { %3483 = vmatpush1.bf16.msra.mxu0 %v5523_v57  ;;  %3811 = vmatpush1.bf16.msra.mxu1 %v5526_v58  ;;  %v3876_v57 = vld [vmem:[%s7443_s3 + $0x128] sm:$0xff]  ;;  %v3861_v58 = vld [vmem:[%s7443_s3 + $0xb0] sm:$0xff] }
 0x1e4   :  { %3484 = vmatprep.subr.bf16.mxu0 %v5531_v59  ;;  %3812 = vmatprep.subr.bf16.mxu1 %v5534_v60  ;;  %v3862_v59 = vld [vmem:[%s7443_s3 + $0xb8] sm:$0xff]  ;;  %v3893_v60 = vld [vmem:[%s7443_s3 + $0x1b0] sm:$0xff] }
 0x1e7   :  { %3485 = vmatpush1.bf16.msra.mxu0 %v5529_v61  ;;  %3813 = vmatpush1.bf16.msra.mxu1 %v5532_v62  ;;  %v3894_v61 = vld [vmem:[%s7443_s3 + $0x1b8] sm:$0xff]  ;;  %v4674_v62 = vpack.c.bf16 %v3844_v53, %v3843_v52  ;;  %v3885_v53 = vld [vmem:[%s7443_s3 + $0x170] sm:$0xff] }
 0x1e8   :  { %3486 = vmatprep.subr.bf16.mxu0 %v5537_v63  ;;  %3814 = vmatprep.subr.bf16.mxu1 %v5540_v0  ;;  %v4706_v63 = vpack.c.bf16 %v3876_v57, %v3875_v56  ;;  %v3845_v0 = vld [vmem:[%s7443_s3 + $0x30] sm:$0xff]  ;;  %v543_v56 = vlaneseq }
 0x1ea   :  { %v544_v57 = vshrl.u32 %v543_v56, 7 }
 0x1eb   :  { %3487 = vmatpush1.bf16.msra.mxu0 %v5535_v1  ;;  %3815 = vmatpush1.bf16.msra.mxu1 %v5538_v2  ;;  %v3846_v1 = vld [vmem:[%s7443_s3 + $0x38] sm:$0xff]  ;;  %v4676_v2 = vpack.c.bf16 %v3862_v59, %v3861_v58 }
 0x1ec   :  { %3488 = vmatprep.subr.bf16.mxu0 %v5543_v3  ;;  %3816 = vmatprep.subr.bf16.mxu1 %v5546_v4  ;;  %v4708_v3 = vpack.c.bf16 %v3894_v61, %v3893_v60  ;;  %v3877_v4 = vld [vmem:[%s7443_s3 + $0x130] sm:$0xff]  ;;  %v545_v58 = vsub.s32 0, %v544_v57  ;;  %v553_v59 = vsub.s32 2, %v544_v57  ;;  %v541_v60 = vld [vmem:[%s7442_s2] sm:$0xf]  ;;  %v549_v61 = vsub.s32 1, %v544_v57 }
 0x1ef   :  { %3489 = vmatpush1.bf16.msra.mxu0 %v5541_v5  ;;  %3817 = vmatpush1.bf16.msra.mxu1 %v5544_v6  ;;  %v3878_v5 = vld [vmem:[%s7443_s3 + $0x138] sm:$0xff]  ;;  %v3863_v6 = vld [vmem:[%s7443_s3 + $0xc0] sm:$0xff] }
 0x1f0   :  { %3490 = vmatprep.subr.bf16.mxu0 %v5549_v7  ;;  %3818 = vmatprep.subr.bf16.mxu1 %v5552_v8  ;;  %v3864_v7 = vld [vmem:[%s7443_s3 + $0xc8] sm:$0xff]  ;;  %v3895_v8 = vld [vmem:[%s7443_s3 + $0x1c0] sm:$0xff] }
 0x1f3   :  { %3491 = vmatpush1.bf16.msra.mxu0 %v5547_v9  ;;  %3819 = vmatpush1.bf16.msra.mxu1 %v5550_v10  ;;  %v3896_v9 = vld [vmem:[%s7443_s3 + $0x1c8] sm:$0xff]  ;;  %v4678_v10 = vpack.c.bf16 %v3846_v1, %v3845_v0  ;;  %v554_v0 = vrot.slane %v541_v60, %v553_v59  ;;  %v550_v1 = vrot.slane %v541_v60, %v549_v61 }
 0x1f4   :  { %3492 = vmatprep.subr.bf16.mxu0 %v5555_v12  ;;  %3820 = vmatprep.subr.bf16.mxu1 %v5558_v13  ;;  %v4710_v12 = vpack.c.bf16 %v3878_v5, %v3877_v4  ;;  %v3847_v13 = vld [vmem:[%s7443_s3 + $0x40] sm:$0xff] }
 0x1f7   :  { %3493 = vmatpush1.bf16.msra.mxu0 %v5553_v15  ;;  %3821 = vmatpush1.bf16.msra.mxu1 %v5556_v11  ;;  %v3848_v15 = vld [vmem:[%s7443_s3 + $0x48] sm:$0xff]  ;;  %v4680_v11 = vpack.c.bf16 %v3864_v7, %v3863_v6 }
 0x1f8   :  { %3494 = vmatprep.subr.bf16.mxu0 %v5561_v17  ;;  %3822 = vmatprep.subr.bf16.mxu1 %v5564_v14  ;;  %v4712_v17 = vpack.c.bf16 %v3896_v9, %v3895_v8  ;;  %v3879_v14 = vld [vmem:[%s7443_s3 + $0x140] sm:$0xff]  ;;  %v4682_v18 = vpack.c.bf16 %v3848_v15, %v3847_v13 }
 0x1fb   :  { %3495 = vmatpush1.bf16.msra.mxu0 %v5559_v19  ;;  %3823 = vmatpush1.bf16.msra.mxu1 %v5562_v20  ;;  %v3880_v19 = vld [vmem:[%s7443_s3 + $0x148] sm:$0xff]  ;;  %v3865_v20 = vld [vmem:[%s7443_s3 + $0xd0] sm:$0xff] }
 0x1fc   :  { %3496 = vmatprep.subr.bf16.mxu0 %v5567_v21  ;;  %3824 = vmatprep.subr.bf16.mxu1 %v5570_v22  ;;  %v3866_v21 = vld [vmem:[%s7443_s3 + $0xd8] sm:$0xff]  ;;  %v3897_v22 = vld [vmem:[%s7443_s3 + $0x1d0] sm:$0xff]  ;;  %v4714_v25 = vpack.c.bf16 %v3880_v19, %v3879_v14 }
 0x1fd   :  { %v4716_v28 = vpack.c.bf16 %v3898_v23, %v3897_v22  ;;  %v4593_v23 = vld [vmem:[%s7444_s4] ss:$0 sm:$0xff] }
 0x1ff   :  { %3497 = vmatpush1.bf16.msra.mxu0 %v5565_v16  ;;  %3825 = vmatpush1.bf16.msra.mxu1 %v5568_v27  ;;  %v3850_v16 = vld [vmem:[%s7443_s3 + $0x58] sm:$0xff]  ;;  %v4684_v27 = vpack.c.bf16 %v3866_v21, %v3865_v20 }
 0x200   :  { %4665 = vmatprep.subr.bf16.mxu0 %v4664_v30  ;;  %4697 = vmatprep.subr.bf16.mxu1 %v4696_v31  ;;  %v3882_v30 = vld [vmem:[%s7443_s3 + $0x158] sm:$0xff]  ;;  %v3867_v31 = vld [vmem:[%s7443_s3 + $0xe0] sm:$0xff]  ;;  %v4686_v35 = vpack.c.bf16 %v3850_v16, %v3849_v26 }
 0x201   :  { %v4718_v36 = vpack.c.bf16 %v3882_v30, %v3881_v29  ;;  %v4688_v37 = vpack.c.bf16 %v3868_v32, %v3867_v31 }
 0x202   :  { %3499 = vmatmul.mubr.bf16.vlgmr.msra.gmra.mrb[0].mxu0 %v4079_v38  ;;  %3827 = vmatmul.mubr.bf16.vlgmr.msra.gmra.mrb[0].mxu1 %v4079_v38  ;;  %v4720_v38 = vpack.c.bf16 %v3900_v34, %v3899_v33 }
 0x203   :  { %4667 = vmatpush3.bf16.msra.mxu0 %v4666_v39  ;;  %4699 = vmatpush3.bf16.msra.mxu1 %v4698_v40  ;;  %v3851_v39 = vld [vmem:[%s7443_s3 + $0x60] sm:$0xff]  ;;  %v3852_v40 = vld [vmem:[%s7443_s3 + $0x68] sm:$0xff] }
 0x204   :  { %4669 = vmatprep.subr.bf16.mxu0 %v4668_v43  ;;  %4701 = vmatprep.subr.bf16.mxu1 %v4700_v44  ;;  %v4690_v42 = vpack.c.bf16 %v3852_v40, %v3851_v39  ;;  %v3884_v43 = vld [vmem:[%s7443_s3 + $0x168] sm:$0xff] }
 0x205   :  { %v4722_v44 = vpack.c.bf16 %v3884_v43, %v3883_v41 }
 0x207   :  { %4671 = vmatpush3.bf16.msra.mxu0 %v4670_v50  ;;  %4703 = vmatpush3.bf16.msra.mxu1 %v4702_v51  ;;  %v3854_v50 = vld [vmem:[%s7443_s3 + $0x78] sm:$0xff]  ;;  %v4724_v51 = vpack.c.bf16 %v3902_v48, %v3901_v46 }
 0x208   :  { %4673 = vmatprep.subr.bf16.mxu0 %v4672_v54  ;;  %4705 = vmatprep.subr.bf16.mxu1 %v4704_v55  ;;  %v4694_v52 = vpack.c.bf16 %v3854_v50, %v3853_v49  ;;  %v3886_v54 = vld [vmem:[%s7443_s3 + $0x178] sm:$0xff] }
 0x209   :  { %v4726_v55 = vpack.c.bf16 %v3886_v54, %v3885_v53 }
 0x20b   :  { %4675 = vmatpush3.bf16.msra.mxu0 %v4674_v62  ;;  %4707 = vmatpush3.bf16.msra.mxu1 %v4706_v63  ;;  %v557_v62 = vsub.s32 3, %v544_v57  ;;  %v546_v63 = vrot.slane %v541_v60, %v545_v58 }
 0x20c   :  { %4677 = vmatprep.subr.bf16.mxu0 %v4676_v2  ;;  %4709 = vmatprep.subr.bf16.mxu1 %v4708_v3 }
 0x20d   :  { %v558_v2 = vrot.slane %v541_v60, %v557_v62 }
 0x20f   :  { %4679 = vmatpush3.bf16.msra.mxu0 %v4678_v10  ;;  %4711 = vmatpush3.bf16.msra.mxu1 %v4710_v12 }
 0x210   :  { %4681 = vmatprep.subr.bf16.mxu0 %v4680_v11  ;;  %4713 = vmatprep.subr.bf16.mxu1 %v4712_v17 }
 0x213   :  { %4683 = vmatpush3.bf16.msra.mxu0 %v4682_v18  ;;  %4715 = vmatpush3.bf16.msra.mxu1 %v4714_v25 }
 0x214   :  { %4685 = vmatprep.subr.bf16.mxu0 %v4684_v27  ;;  %4717 = vmatprep.subr.bf16.mxu1 %v4716_v28 }
 0x217   :  { %4687 = vmatpush3.bf16.msra.mxu0 %v4686_v35  ;;  %4719 = vmatpush3.bf16.msra.mxu1 %v4718_v36 }
 0x218   :  { %4689 = vmatprep.subr.bf16.mxu0 %v4688_v37  ;;  %4721 = vmatprep.subr.bf16.mxu1 %v4720_v38 }
 0x21b   :  { %4691 = vmatpush3.bf16.msra.mxu0 %v4690_v42  ;;  %4723 = vmatpush3.bf16.msra.mxu1 %v4722_v44 }
 0x21c   :  { %4693 = vmatprep.subr.bf16.mxu0 %v4692_v47  ;;  %4725 = vmatprep.subr.bf16.mxu1 %v4724_v51 }
 0x21f   :  { %4695 = vmatpush3.bf16.msra.mxu0 %v4694_v52  ;;  %4727 = vmatpush3.bf16.msra.mxu1 %v4726_v55 }
 0x2d5   :  { %v3500_v3 = vpop.f32.mrb[0].mxu0  ;;  %v3828_v4 = vpop.f32.mrb[0].mxu1 }
 0x2d6   :  { %v4728_v5 = vadd.f32 %v3500_v3, %v546_v63  ;;  %v4730_v6 = vadd.f32 %v3828_v4, %v554_v0  ;;  %v3502_v7 = vpop.f32.mrb[1].mxu0  ;;  %v3830_v8 = vpop.f32.mrb[1].mxu1 }
 0x2d7   :  { %v4729_v9 = vadd.f32 %v3502_v7, %v550_v1  ;;  %v4731_v10 = vadd.f32 %v3830_v8, %v558_v2  ;;  %v3504_v12 = vpop.f32.mrb[2].mxu0  ;;  %v3832_v13 = vpop.f32.mrb[2].mxu1 }
 0x2d8   :  { %v3505_v15 = vpop.f32.mrb[3].mxu0  ;;  %v3833_v11 = vpop.f32.mrb[3].mxu1  ;;  %v3835_v19 = vmax.f32 %v4728_v5, 0.0  ;;  %v3837_v20 = vmax.f32 %v4730_v6, 0.0 }
 0x2d9   :  { %v3836_v17 = vmax.f32 %v4729_v9, 0.0  ;;  %v3838_v14 = vmax.f32 %v4731_v10, 0.0 }
 0x2db   :  { %3974 = vmatprep.mubr.f32.mxu0 %v3836_v17  ;;  %4044 = vmatprep.mubr.f32.mxu1 %v3838_v14 }
 0x2dc   :  { %3975 = vmatmul.mubr.f32.vlgmr.msra.gmra.mrb[4].mxu0 %v3835_v19  ;;  %4045 = vmatmul.mubr.f32.vlgmr.msra.gmra.mrb[4].mxu1 %v3837_v20 }
 0x3af   :  { %v4626_v21 = vpop.f32.mrb[4].mxu0  ;;  %v4661_v22 = vpop.f32.mrb[4].mxu1 }
 0x3b0   :  { %v4627_v18 = vpop.f32.mrb[5].mxu0  ;;  %v4662_v25 = vpop.f32.mrb[5].mxu1 }
 0x3b1   :  { %v4628_v26 = vadd.f32 %v4627_v18, %v4626_v21  ;;  %v4663_v16 = vadd.f32 %v4662_v25, %v4661_v22 }
 0x3b3   :  { %v3977_v27 = vadd.f32 %v4628_v26, %v4593_v23 }
 0x3b5   :  { %v4047_v28 = vadd.f32 %v4663_v16, %v3977_v27 }
 0x3b7   :  { %4050 = vst [vmem:[#allocation2] sm:$0xff] %v4047_v28 }
 0x3b8   :  { %5584 = shalt.err (!%p5581_p4)
}
 0x3b9   :  { %s5585_s4 = scalar_lea.hbm %s7445_s5, 128 }
 0x3ba   :  { %p5586_p5 = scmp.ne.s32.totalorder %s7445_s5, %s5585_s4  ;;  %p5589_p6 = scmp.lt.u32.totalorder %s5585_s4, %s7445_s5 }
 0x3bc   :  { %p5591_p7 = pnand %p5589_p6, %p5586_p5 }
 0x3be   :  { %5594 = shalt.err (!%p5591_p7)
}
 0x3bf   :  { %4060 = dma.vmem_to_hbm [thread:$0]  %s4058_s24, 128, %s7445_s5, [#allocation3]  }
 0x3c0   :  { %5595 = dma.done.wait [#allocation3], 128  }
 0x3c1   :  { %5596 = vsyncadd [#allocation3], 4294967168 }
 0x3c2   :  { %4064 = vsyncpa [#allocation3], 1 }

</bundles_post_ra>
